<compile_context>
chip_gen: v7x
topology: tpu7x:2x2x1
jax: 0.10.0
libtpu: 0.0.40
codegen_flags: <defaults>
</compile_context>

<pallas_src>
import functools

import jax
import jax.numpy as jnp
from jax.experimental import pallas as pl
from jax.experimental.pallas import tpu as pltpu

BN_EPS = 1e-5
NEG_SLOPE = 0.01  # F.leaky_relu default

# (kernel, stride, pad, c_in, c_out) for the four conv layers.
LAYER_CFG = (
    (5, 1, 2, 2, 8),
    (5, 2, 0, 8, 32),
    (5, 2, 0, 32, 128),
    (4, 1, 1, 128, 256),
)


def _out_len(l_in, k, s, p):
    return (l_in + 2 * p - k) // s + 1


def disc_kernel(x_ref, w1_ref, b1_ref, w2_ref, b2_ref, w3_ref, b3_ref,
                w4_ref, b4_ref, out_ref):
    # x_ref: (L, TB, 2) -- batch tile on sublanes, channels on lanes.
    L = x_ref.shape[0]
    tb = x_ref.shape[1]

    def conv_bn_lrelu(x_list, w_ref, b_ref, k, stride, pad, c_in):
        l_in = len(x_list)
        l_out = _out_len(l_in, k, stride, pad)
        w = w_ref[...]                                   # (k*c_in, c_out), BN folded
        b = b_ref[...]                                   # (1, c_out), BN folded
        zero = jnp.zeros((tb, c_in), jnp.float32) if pad > 0 else None
        ys = []
        for t in range(l_out):                           # static unrolled loop
            parts = []
            for j in range(k):
                idx = t * stride - pad + j
                parts.append(x_list[idx] if 0 <= idx < l_in else zero)
            win = jnp.concatenate(parts, axis=1)         # (tb, k*c_in) lane concat
            h = jnp.dot(win, w, preferred_element_type=jnp.float32) + b
            ys.append(jnp.where(h >= 0.0, h, NEG_SLOPE * h))
        return ys

    # Sequence positions as a list of 2-D (tb, c) tiles -> everything stays 2-D.
    h = [x_ref[i] for i in range(L)]                     # each (tb, 2)
    layer_refs = ((w1_ref, b1_ref), (w2_ref, b2_ref), (w3_ref, b3_ref), (w4_ref, b4_ref))
    for (w_ref, b_ref), (k, s, p, c_in, _) in zip(layer_refs, LAYER_CFG):
        h = conv_bn_lrelu(h, w_ref, b_ref, k, s, p, c_in)

    # torch: transpose + flatten -> position-major, channel-minor. Same order here.
    out_ref[...] = h[0] if len(h) == 1 else jnp.concatenate(h, axis=1)


def fold_params(p):
    """One-time transform: fold eval-mode BatchNorm into the conv weights/biases."""
    folded = {}
    for l, (k, _, _, c_in, c_out) in enumerate(LAYER_CFG, start=1):
        w = p[f"w{l}"]                                   # (c_out, c_in, k) torch layout
        b = p[f"b{l}"]                                   # (c_out,)
        scale = p[f"gamma{l}"] * jax.lax.rsqrt(p[f"var{l}"] + BN_EPS)
        wf = jnp.transpose(w, (2, 1, 0)).reshape(k * c_in, c_out) * scale[None, :]
        bf = (b - p[f"mean{l}"]) * scale + p[f"beta{l}"]
        folded[f"w{l}"] = wf.astype(jnp.float32)         # (k*c_in, c_out)
        folded[f"b{l}"] = bf.reshape(1, c_out).astype(jnp.float32)
    return folded


def discriminator_forward(x, folded, *, tile_b=8):
    B, L, c0 = x.shape
    l1 = _out_len(L, 5, 1, 2)
    l2 = _out_len(l1, 5, 2, 0)
    l3 = _out_len(l2, 5, 2, 0)
    l4 = _out_len(l3, 4, 1, 1)
    c_last = LAYER_CFG[-1][-1]
    assert l4 >= 1, "sequence too short for this conv stack"

    # Pad batch to a multiple of the tile and put batch on the sublane axis.
    b_pad = pl.cdiv(B, tile_b) * tile_b
    xp = jnp.pad(x, ((0, b_pad - B), (0, 0), (0, 0)))
    xt = jnp.transpose(xp, (1, 0, 2))                    # (L, b_pad, 2)

    def const_spec(shape):
        return pl.BlockSpec(shape, lambda i: (0,) * len(shape))  # weight stays resident

    in_specs = [pl.BlockSpec((L, tile_b, c0), lambda i: (0, i, 0))]
    args = [xt]
    for l in range(1, 5):
        for name in (f"w{l}", f"b{l}"):
            in_specs.append(const_spec(folded[name].shape))
            args.append(folded[name])

    out = pl.pallas_call(
        disc_kernel,
        out_shape=jax.ShapeDtypeStruct((b_pad, l4 * c_last), jnp.float32),
        grid=(b_pad // tile_b,),
        in_specs=in_specs,
        out_specs=pl.BlockSpec((tile_b, l4 * c_last), lambda i: (i, 0)),
        compiler_params=pltpu.CompilerParams(dimension_semantics=("parallel",)),
    )(*args)
    return out[:B]


def make_params(key):
    """Deterministic synthetic parameters with torch layouts/shapes."""
    p = {}
    keys = jax.random.split(key, 4 * 6)
    i = 0
    for l, (k, _, _, c_in, c_out) in enumerate(LAYER_CFG, start=1):
        p[f"w{l}"] = 0.1 * jax.random.normal(keys[i], (c_out, c_in, k), jnp.float32); i += 1
        p[f"b{l}"] = 0.05 * jax.random.normal(keys[i], (c_out,), jnp.float32); i += 1
        p[f"gamma{l}"] = 1.0 + 0.1 * jax.random.normal(keys[i], (c_out,), jnp.float32); i += 1
        p[f"beta{l}"] = 0.05 * jax.random.normal(keys[i], (c_out,), jnp.float32); i += 1
        p[f"mean{l}"] = 0.05 * jax.random.normal(keys[i], (c_out,), jnp.float32); i += 1
        p[f"var{l}"] = jnp.abs(1.0 + 0.1 * jax.random.normal(keys[i], (c_out,), jnp.float32)); i += 1
    return p


def discriminator_reference(x, p):
    """Pure-JAX reference with identical (eval-mode) semantics, unfolded params."""
    h = x                                                # (B, L, 2), channels-last
    for l, (k, s, pad, c_in, c_out) in enumerate(LAYER_CFG, start=1):
        rhs = jnp.transpose(p[f"w{l}"], (2, 1, 0))       # (k, c_in, c_out) 'WIO'
        h = jax.lax.conv_general_dilated(
            h, rhs, window_strides=(s,), padding=[(pad, pad)],
            dimension_numbers=("NWC", "WIO", "NWC")) + p[f"b{l}"][None, None, :]
        h = (h - p[f"mean{l}"]) * jax.lax.rsqrt(p[f"var{l}"] + BN_EPS) * p[f"gamma{l}"] \
            + p[f"beta{l}"]
        h = jnp.where(h >= 0.0, h, NEG_SLOPE * h)
    return h.reshape(h.shape[0], -1)                     # (B, L4*256)


if __name__ == "__main__":
    B, L = 12, 20                                        # Argoverse-like trajectories (B, L, 2)
    kx, kp = jax.random.split(jax.random.PRNGKey(0))
    x = jax.random.normal(kx, (B, L, 2), jnp.float32)
    params = make_params(kp)
    folded = fold_params(params)

    fwd = jax.jit(functools.partial(discriminator_forward, tile_b=8))
    out = jax.block_until_ready(fwd(x, folded))

    ref = discriminator_reference(x, params)
    assert out.shape == ref.shape == (B, 256), (out.shape, ref.shape)
    assert jnp.allclose(out, ref, atol=1e-4, rtol=1e-4), float(jnp.max(jnp.abs(out - ref)))

    print("KERNEL_OK")
</pallas_src>

<mosaic_0001>
module attributes {stable_mosaic.version = 11 : i64} {
  func.func @disc_kernel(%arg0: i32, %arg1: memref<20x8x2xf32, #tpu.memory_space<vmem>>, %arg2: memref<10x8xf32, #tpu.memory_space<vmem>>, %arg3: memref<1x8xf32, #tpu.memory_space<vmem>>, %arg4: memref<40x32xf32, #tpu.memory_space<vmem>>, %arg5: memref<1x32xf32, #tpu.memory_space<vmem>>, %arg6: memref<160x128xf32, #tpu.memory_space<vmem>>, %arg7: memref<1x128xf32, #tpu.memory_space<vmem>>, %arg8: memref<512x256xf32, #tpu.memory_space<vmem>>, %arg9: memref<1x256xf32, #tpu.memory_space<vmem>>, %arg10: memref<8x256xf32, #tpu.memory_space<vmem>>) attributes {dimension_semantics = [#tpu.dimension_semantics<parallel>], iteration_bounds = array<i64: 2>, scalar_prefetch = 0 : i64, scratch_operands = 0 : i64, tpu.core_type = #tpu.core_type<tc>, window_params = [{transform_indices = @transform_0, window_bounds = array<i64: 20, 8, 2>}, {pipeline_mode = #tpu.pipeline_mode<synchronous>, transform_indices = @transform_1, window_bounds = array<i64: 10, 8>}, {pipeline_mode = #tpu.pipeline_mode<synchronous>, transform_indices = @transform_2, window_bounds = array<i64: 1, 8>}, {pipeline_mode = #tpu.pipeline_mode<synchronous>, transform_indices = @transform_3, window_bounds = array<i64: 40, 32>}, {pipeline_mode = #tpu.pipeline_mode<synchronous>, transform_indices = @transform_4, window_bounds = array<i64: 1, 32>}, {pipeline_mode = #tpu.pipeline_mode<synchronous>, transform_indices = @transform_5, window_bounds = array<i64: 160, 128>}, {pipeline_mode = #tpu.pipeline_mode<synchronous>, transform_indices = @transform_6, window_bounds = array<i64: 1, 128>}, {pipeline_mode = #tpu.pipeline_mode<synchronous>, transform_indices = @transform_7, window_bounds = array<i64: 512, 256>}, {pipeline_mode = #tpu.pipeline_mode<synchronous>, transform_indices = @transform_8, window_bounds = array<i64: 1, 256>}, {transform_indices = @transform_9, window_bounds = array<i64: 8, 256>}]} {
    %c0 = arith.constant 0 : index
    %c0_0 = arith.constant 0 : index
    %c0_1 = arith.constant 0 : index
    %0 = vector.load %arg1[%c0, %c0_0, %c0_1] : memref<20x8x2xf32, #tpu.memory_space<vmem>>, vector<1x8x2xf32>
    %1 = vector.shape_cast %0 : vector<1x8x2xf32> to vector<8x2xf32>
    %c1 = arith.constant 1 : index
    %c0_2 = arith.constant 0 : index
    %c0_3 = arith.constant 0 : index
    %2 = vector.load %arg1[%c1, %c0_2, %c0_3] : memref<20x8x2xf32, #tpu.memory_space<vmem>>, vector<1x8x2xf32>
    %3 = vector.shape_cast %2 : vector<1x8x2xf32> to vector<8x2xf32>
    %c2 = arith.constant 2 : index
    %c0_4 = arith.constant 0 : index
    %c0_5 = arith.constant 0 : index
    %4 = vector.load %arg1[%c2, %c0_4, %c0_5] : memref<20x8x2xf32, #tpu.memory_space<vmem>>, vector<1x8x2xf32>
    %5 = vector.shape_cast %4 : vector<1x8x2xf32> to vector<8x2xf32>
    %c3 = arith.constant 3 : index
    %c0_6 = arith.constant 0 : index
    %c0_7 = arith.constant 0 : index
    %6 = vector.load %arg1[%c3, %c0_6, %c0_7] : memref<20x8x2xf32, #tpu.memory_space<vmem>>, vector<1x8x2xf32>
    %7 = vector.shape_cast %6 : vector<1x8x2xf32> to vector<8x2xf32>
    %c4 = arith.constant 4 : index
    %c0_8 = arith.constant 0 : index
    %c0_9 = arith.constant 0 : index
    %8 = vector.load %arg1[%c4, %c0_8, %c0_9] : memref<20x8x2xf32, #tpu.memory_space<vmem>>, vector<1x8x2xf32>
    %9 = vector.shape_cast %8 : vector<1x8x2xf32> to vector<8x2xf32>
    %c5 = arith.constant 5 : index
    %c0_10 = arith.constant 0 : index
    %c0_11 = arith.constant 0 : index
    %10 = vector.load %arg1[%c5, %c0_10, %c0_11] : memref<20x8x2xf32, #tpu.memory_space<vmem>>, vector<1x8x2xf32>
    %11 = vector.shape_cast %10 : vector<1x8x2xf32> to vector<8x2xf32>
    %c6 = arith.constant 6 : index
    %c0_12 = arith.constant 0 : index
    %c0_13 = arith.constant 0 : index
    %12 = vector.load %arg1[%c6, %c0_12, %c0_13] : memref<20x8x2xf32, #tpu.memory_space<vmem>>, vector<1x8x2xf32>
    %13 = vector.shape_cast %12 : vector<1x8x2xf32> to vector<8x2xf32>
    %c7 = arith.constant 7 : index
    %c0_14 = arith.constant 0 : index
    %c0_15 = arith.constant 0 : index
    %14 = vector.load %arg1[%c7, %c0_14, %c0_15] : memref<20x8x2xf32, #tpu.memory_space<vmem>>, vector<1x8x2xf32>
    %15 = vector.shape_cast %14 : vector<1x8x2xf32> to vector<8x2xf32>
    %c8 = arith.constant 8 : index
    %c0_16 = arith.constant 0 : index
    %c0_17 = arith.constant 0 : index
    %16 = vector.load %arg1[%c8, %c0_16, %c0_17] : memref<20x8x2xf32, #tpu.memory_space<vmem>>, vector<1x8x2xf32>
    %17 = vector.shape_cast %16 : vector<1x8x2xf32> to vector<8x2xf32>
    %c9 = arith.constant 9 : index
    %c0_18 = arith.constant 0 : index
    %c0_19 = arith.constant 0 : index
    %18 = vector.load %arg1[%c9, %c0_18, %c0_19] : memref<20x8x2xf32, #tpu.memory_space<vmem>>, vector<1x8x2xf32>
    %19 = vector.shape_cast %18 : vector<1x8x2xf32> to vector<8x2xf32>
    %c10 = arith.constant 10 : index
    %c0_20 = arith.constant 0 : index
    %c0_21 = arith.constant 0 : index
    %20 = vector.load %arg1[%c10, %c0_20, %c0_21] : memref<20x8x2xf32, #tpu.memory_space<vmem>>, vector<1x8x2xf32>
    %21 = vector.shape_cast %20 : vector<1x8x2xf32> to vector<8x2xf32>
    %c11 = arith.constant 11 : index
    %c0_22 = arith.constant 0 : index
    %c0_23 = arith.constant 0 : index
    %22 = vector.load %arg1[%c11, %c0_22, %c0_23] : memref<20x8x2xf32, #tpu.memory_space<vmem>>, vector<1x8x2xf32>
    %23 = vector.shape_cast %22 : vector<1x8x2xf32> to vector<8x2xf32>
    %c12 = arith.constant 12 : index
    %c0_24 = arith.constant 0 : index
    %c0_25 = arith.constant 0 : index
    %24 = vector.load %arg1[%c12, %c0_24, %c0_25] : memref<20x8x2xf32, #tpu.memory_space<vmem>>, vector<1x8x2xf32>
    %25 = vector.shape_cast %24 : vector<1x8x2xf32> to vector<8x2xf32>
    %c13 = arith.constant 13 : index
    %c0_26 = arith.constant 0 : index
    %c0_27 = arith.constant 0 : index
    %26 = vector.load %arg1[%c13, %c0_26, %c0_27] : memref<20x8x2xf32, #tpu.memory_space<vmem>>, vector<1x8x2xf32>
    %27 = vector.shape_cast %26 : vector<1x8x2xf32> to vector<8x2xf32>
    %c14 = arith.constant 14 : index
    %c0_28 = arith.constant 0 : index
    %c0_29 = arith.constant 0 : index
    %28 = vector.load %arg1[%c14, %c0_28, %c0_29] : memref<20x8x2xf32, #tpu.memory_space<vmem>>, vector<1x8x2xf32>
    %29 = vector.shape_cast %28 : vector<1x8x2xf32> to vector<8x2xf32>
    %c15 = arith.constant 15 : index
    %c0_30 = arith.constant 0 : index
    %c0_31 = arith.constant 0 : index
    %30 = vector.load %arg1[%c15, %c0_30, %c0_31] : memref<20x8x2xf32, #tpu.memory_space<vmem>>, vector<1x8x2xf32>
    %31 = vector.shape_cast %30 : vector<1x8x2xf32> to vector<8x2xf32>
    %c16 = arith.constant 16 : index
    %c0_32 = arith.constant 0 : index
    %c0_33 = arith.constant 0 : index
    %32 = vector.load %arg1[%c16, %c0_32, %c0_33] : memref<20x8x2xf32, #tpu.memory_space<vmem>>, vector<1x8x2xf32>
    %33 = vector.shape_cast %32 : vector<1x8x2xf32> to vector<8x2xf32>
    %c17 = arith.constant 17 : index
    %c0_34 = arith.constant 0 : index
    %c0_35 = arith.constant 0 : index
    %34 = vector.load %arg1[%c17, %c0_34, %c0_35] : memref<20x8x2xf32, #tpu.memory_space<vmem>>, vector<1x8x2xf32>
    %35 = vector.shape_cast %34 : vector<1x8x2xf32> to vector<8x2xf32>
    %c18 = arith.constant 18 : index
    %c0_36 = arith.constant 0 : index
    %c0_37 = arith.constant 0 : index
    %36 = vector.load %arg1[%c18, %c0_36, %c0_37] : memref<20x8x2xf32, #tpu.memory_space<vmem>>, vector<1x8x2xf32>
    %37 = vector.shape_cast %36 : vector<1x8x2xf32> to vector<8x2xf32>
    %c0_38 = arith.constant 0 : index
    %c0_39 = arith.constant 0 : index
    %38 = vector.load %arg2[%c0_38, %c0_39] : memref<10x8xf32, #tpu.memory_space<vmem>>, vector<10x8xf32>
    %c0_40 = arith.constant 0 : index
    %c0_41 = arith.constant 0 : index
    %39 = vector.load %arg3[%c0_40, %c0_41] : memref<1x8xf32, #tpu.memory_space<vmem>>, vector<1x8xf32>
    %cst = arith.constant 0.000000e+00 : f32
    %40 = vector.broadcast %cst : f32 to vector<8x2xf32>
    %41 = tpu.concatenate %40, %40, %1, %3, %5 in 1 : vector<8x2xf32>, vector<8x2xf32>, vector<8x2xf32>, vector<8x2xf32>, vector<8x2xf32> -> vector<8x10xf32>
    %cst_42 = arith.constant dense<0.000000e+00> : vector<8x8xf32>
    %42 = tpu.matmul %41, %38, %cst_42 {dimension_numbers = #tpu.dot_dimension_numbers<[1], [0], [0], [1], [0, 0, 1, 1], [], []>} : vector<8x10xf32>, vector<10x8xf32>, vector<8x8xf32> -> vector<8x8xf32>
    %43 = vector.broadcast %39 : vector<1x8xf32> to vector<8x8xf32>
    %44 = arith.addf %42, %43 : vector<8x8xf32>
    %cst_43 = arith.constant 0.000000e+00 : f32
    %45 = vector.broadcast %cst_43 : f32 to vector<8x8xf32>
    %46 = arith.cmpf oge, %44, %45 : vector<8x8xf32>
    %cst_44 = arith.constant 0.00999999977 : f32
    %47 = vector.broadcast %cst_44 : f32 to vector<8x8xf32>
    %48 = arith.mulf %47, %44 : vector<8x8xf32>
    %49 = arith.select %46, %44, %48 : vector<8x8xi1>, vector<8x8xf32>
    %50 = tpu.concatenate %40, %1, %3, %5, %7 in 1 : vector<8x2xf32>, vector<8x2xf32>, vector<8x2xf32>, vector<8x2xf32>, vector<8x2xf32> -> vector<8x10xf32>
    %cst_45 = arith.constant dense<0.000000e+00> : vector<8x8xf32>
    %51 = tpu.matmul %50, %38, %cst_45 {dimension_numbers = #tpu.dot_dimension_numbers<[1], [0], [0], [1], [0, 0, 1, 1], [], []>} : vector<8x10xf32>, vector<10x8xf32>, vector<8x8xf32> -> vector<8x8xf32>
    %52 = vector.broadcast %39 : vector<1x8xf32> to vector<8x8xf32>
    %53 = arith.addf %51, %52 : vector<8x8xf32>
    %cst_46 = arith.constant 0.000000e+00 : f32
    %54 = vector.broadcast %cst_46 : f32 to vector<8x8xf32>
    %55 = arith.cmpf oge, %53, %54 : vector<8x8xf32>
    %cst_47 = arith.constant 0.00999999977 : f32
    %56 = vector.broadcast %cst_47 : f32 to vector<8x8xf32>
    %57 = arith.mulf %56, %53 : vector<8x8xf32>
    %58 = arith.select %55, %53, %57 : vector<8x8xi1>, vector<8x8xf32>
    %59 = tpu.concatenate %1, %3, %5, %7, %9 in 1 : vector<8x2xf32>, vector<8x2xf32>, vector<8x2xf32>, vector<8x2xf32>, vector<8x2xf32> -> vector<8x10xf32>
    %cst_48 = arith.constant dense<0.000000e+00> : vector<8x8xf32>
    %60 = tpu.matmul %59, %38, %cst_48 {dimension_numbers = #tpu.dot_dimension_numbers<[1], [0], [0], [1], [0, 0, 1, 1], [], []>} : vector<8x10xf32>, vector<10x8xf32>, vector<8x8xf32> -> vector<8x8xf32>
    %61 = vector.broadcast %39 : vector<1x8xf32> to vector<8x8xf32>
    %62 = arith.addf %60, %61 : vector<8x8xf32>
    %cst_49 = arith.constant 0.000000e+00 : f32
    %63 = vector.broadcast %cst_49 : f32 to vector<8x8xf32>
    %64 = arith.cmpf oge, %62, %63 : vector<8x8xf32>
    %cst_50 = arith.constant 0.00999999977 : f32
    %65 = vector.broadcast %cst_50 : f32 to vector<8x8xf32>
    %66 = arith.mulf %65, %62 : vector<8x8xf32>
    %67 = arith.select %64, %62, %66 : vector<8x8xi1>, vector<8x8xf32>
    %68 = tpu.concatenate %3, %5, %7, %9, %11 in 1 : vector<8x2xf32>, vector<8x2xf32>, vector<8x2xf32>, vector<8x2xf32>, vector<8x2xf32> -> vector<8x10xf32>
    %cst_51 = arith.constant dense<0.000000e+00> : vector<8x8xf32>
    %69 = tpu.matmul %68, %38, %cst_51 {dimension_numbers = #tpu.dot_dimension_numbers<[1], [0], [0], [1], [0, 0, 1, 1], [], []>} : vector<8x10xf32>, vector<10x8xf32>, vector<8x8xf32> -> vector<8x8xf32>
    %70 = vector.broadcast %39 : vector<1x8xf32> to vector<8x8xf32>
    %71 = arith.addf %69, %70 : vector<8x8xf32>
    %cst_52 = arith.constant 0.000000e+00 : f32
    %72 = vector.broadcast %cst_52 : f32 to vector<8x8xf32>
    %73 = arith.cmpf oge, %71, %72 : vector<8x8xf32>
    %cst_53 = arith.constant 0.00999999977 : f32
    %74 = vector.broadcast %cst_53 : f32 to vector<8x8xf32>
    %75 = arith.mulf %74, %71 : vector<8x8xf32>
    %76 = arith.select %73, %71, %75 : vector<8x8xi1>, vector<8x8xf32>
    %77 = tpu.concatenate %5, %7, %9, %11, %13 in 1 : vector<8x2xf32>, vector<8x2xf32>, vector<8x2xf32>, vector<8x2xf32>, vector<8x2xf32> -> vector<8x10xf32>
    %cst_54 = arith.constant dense<0.000000e+00> : vector<8x8xf32>
    %78 = tpu.matmul %77, %38, %cst_54 {dimension_numbers = #tpu.dot_dimension_numbers<[1], [0], [0], [1], [0, 0, 1, 1], [], []>} : vector<8x10xf32>, vector<10x8xf32>, vector<8x8xf32> -> vector<8x8xf32>
    %79 = vector.broadcast %39 : vector<1x8xf32> to vector<8x8xf32>
    %80 = arith.addf %78, %79 : vector<8x8xf32>
    %cst_55 = arith.constant 0.000000e+00 : f32
    %81 = vector.broadcast %cst_55 : f32 to vector<8x8xf32>
    %82 = arith.cmpf oge, %80, %81 : vector<8x8xf32>
    %cst_56 = arith.constant 0.00999999977 : f32
    %83 = vector.broadcast %cst_56 : f32 to vector<8x8xf32>
    %84 = arith.mulf %83, %80 : vector<8x8xf32>
    %85 = arith.select %82, %80, %84 : vector<8x8xi1>, vector<8x8xf32>
    %86 = tpu.concatenate %7, %9, %11, %13, %15 in 1 : vector<8x2xf32>, vector<8x2xf32>, vector<8x2xf32>, vector<8x2xf32>, vector<8x2xf32> -> vector<8x10xf32>
    %cst_57 = arith.constant dense<0.000000e+00> : vector<8x8xf32>
    %87 = tpu.matmul %86, %38, %cst_57 {dimension_numbers = #tpu.dot_dimension_numbers<[1], [0], [0], [1], [0, 0, 1, 1], [], []>} : vector<8x10xf32>, vector<10x8xf32>, vector<8x8xf32> -> vector<8x8xf32>
    %88 = vector.broadcast %39 : vector<1x8xf32> to vector<8x8xf32>
    %89 = arith.addf %87, %88 : vector<8x8xf32>
    %cst_58 = arith.constant 0.000000e+00 : f32
    %90 = vector.broadcast %cst_58 : f32 to vector<8x8xf32>
    %91 = arith.cmpf oge, %89, %90 : vector<8x8xf32>
    %cst_59 = arith.constant 0.00999999977 : f32
    %92 = vector.broadcast %cst_59 : f32 to vector<8x8xf32>
    %93 = arith.mulf %92, %89 : vector<8x8xf32>
    %94 = arith.select %91, %89, %93 : vector<8x8xi1>, vector<8x8xf32>
    %95 = tpu.concatenate %9, %11, %13, %15, %17 in 1 : vector<8x2xf32>, vector<8x2xf32>, vector<8x2xf32>, vector<8x2xf32>, vector<8x2xf32> -> vector<8x10xf32>
    %cst_60 = arith.constant dense<0.000000e+00> : vector<8x8xf32>
    %96 = tpu.matmul %95, %38, %cst_60 {dimension_numbers = #tpu.dot_dimension_numbers<[1], [0], [0], [1], [0, 0, 1, 1], [], []>} : vector<8x10xf32>, vector<10x8xf32>, vector<8x8xf32> -> vector<8x8xf32>
    %97 = vector.broadcast %39 : vector<1x8xf32> to vector<8x8xf32>
    %98 = arith.addf %96, %97 : vector<8x8xf32>
    %cst_61 = arith.constant 0.000000e+00 : f32
    %99 = vector.broadcast %cst_61 : f32 to vector<8x8xf32>
    %100 = arith.cmpf oge, %98, %99 : vector<8x8xf32>
    %cst_62 = arith.constant 0.00999999977 : f32
    %101 = vector.broadcast %cst_62 : f32 to vector<8x8xf32>
    %102 = arith.mulf %101, %98 : vector<8x8xf32>
    %103 = arith.select %100, %98, %102 : vector<8x8xi1>, vector<8x8xf32>
    %104 = tpu.concatenate %11, %13, %15, %17, %19 in 1 : vector<8x2xf32>, vector<8x2xf32>, vector<8x2xf32>, vector<8x2xf32>, vector<8x2xf32> -> vector<8x10xf32>
    %cst_63 = arith.constant dense<0.000000e+00> : vector<8x8xf32>
    %105 = tpu.matmul %104, %38, %cst_63 {dimension_numbers = #tpu.dot_dimension_numbers<[1], [0], [0], [1], [0, 0, 1, 1], [], []>} : vector<8x10xf32>, vector<10x8xf32>, vector<8x8xf32> -> vector<8x8xf32>
    %106 = vector.broadcast %39 : vector<1x8xf32> to vector<8x8xf32>
    %107 = arith.addf %105, %106 : vector<8x8xf32>
    %cst_64 = arith.constant 0.000000e+00 : f32
    %108 = vector.broadcast %cst_64 : f32 to vector<8x8xf32>
    %109 = arith.cmpf oge, %107, %108 : vector<8x8xf32>
    %cst_65 = arith.constant 0.00999999977 : f32
    %110 = vector.broadcast %cst_65 : f32 to vector<8x8xf32>
    %111 = arith.mulf %110, %107 : vector<8x8xf32>
    %112 = arith.select %109, %107, %111 : vector<8x8xi1>, vector<8x8xf32>
    %113 = tpu.concatenate %13, %15, %17, %19, %21 in 1 : vector<8x2xf32>, vector<8x2xf32>, vector<8x2xf32>, vector<8x2xf32>, vector<8x2xf32> -> vector<8x10xf32>
    %cst_66 = arith.constant dense<0.000000e+00> : vector<8x8xf32>
    %114 = tpu.matmul %113, %38, %cst_66 {dimension_numbers = #tpu.dot_dimension_numbers<[1], [0], [0], [1], [0, 0, 1, 1], [], []>} : vector<8x10xf32>, vector<10x8xf32>, vector<8x8xf32> -> vector<8x8xf32>
    %115 = vector.broadcast %39 : vector<1x8xf32> to vector<8x8xf32>
    %116 = arith.addf %114, %115 : vector<8x8xf32>
    %cst_67 = arith.constant 0.000000e+00 : f32
    %117 = vector.broadcast %cst_67 : f32 to vector<8x8xf32>
    %118 = arith.cmpf oge, %116, %117 : vector<8x8xf32>
    %cst_68 = arith.constant 0.00999999977 : f32
    %119 = vector.broadcast %cst_68 : f32 to vector<8x8xf32>
    %120 = arith.mulf %119, %116 : vector<8x8xf32>
    %121 = arith.select %118, %116, %120 : vector<8x8xi1>, vector<8x8xf32>
    %122 = tpu.concatenate %15, %17, %19, %21, %23 in 1 : vector<8x2xf32>, vector<8x2xf32>, vector<8x2xf32>, vector<8x2xf32>, vector<8x2xf32> -> vector<8x10xf32>
    %cst_69 = arith.constant dense<0.000000e+00> : vector<8x8xf32>
    %123 = tpu.matmul %122, %38, %cst_69 {dimension_numbers = #tpu.dot_dimension_numbers<[1], [0], [0], [1], [0, 0, 1, 1], [], []>} : vector<8x10xf32>, vector<10x8xf32>, vector<8x8xf32> -> vector<8x8xf32>
    %124 = vector.broadcast %39 : vector<1x8xf32> to vector<8x8xf32>
    %125 = arith.addf %123, %124 : vector<8x8xf32>
    %cst_70 = arith.constant 0.000000e+00 : f32
    %126 = vector.broadcast %cst_70 : f32 to vector<8x8xf32>
    %127 = arith.cmpf oge, %125, %126 : vector<8x8xf32>
    %cst_71 = arith.constant 0.00999999977 : f32
    %128 = vector.broadcast %cst_71 : f32 to vector<8x8xf32>
    %129 = arith.mulf %128, %125 : vector<8x8xf32>
    %130 = arith.select %127, %125, %129 : vector<8x8xi1>, vector<8x8xf32>
    %131 = tpu.concatenate %17, %19, %21, %23, %25 in 1 : vector<8x2xf32>, vector<8x2xf32>, vector<8x2xf32>, vector<8x2xf32>, vector<8x2xf32> -> vector<8x10xf32>
    %cst_72 = arith.constant dense<0.000000e+00> : vector<8x8xf32>
    %132 = tpu.matmul %131, %38, %cst_72 {dimension_numbers = #tpu.dot_dimension_numbers<[1], [0], [0], [1], [0, 0, 1, 1], [], []>} : vector<8x10xf32>, vector<10x8xf32>, vector<8x8xf32> -> vector<8x8xf32>
    %133 = vector.broadcast %39 : vector<1x8xf32> to vector<8x8xf32>
    %134 = arith.addf %132, %133 : vector<8x8xf32>
    %cst_73 = arith.constant 0.000000e+00 : f32
    %135 = vector.broadcast %cst_73 : f32 to vector<8x8xf32>
    %136 = arith.cmpf oge, %134, %135 : vector<8x8xf32>
    %cst_74 = arith.constant 0.00999999977 : f32
    %137 = vector.broadcast %cst_74 : f32 to vector<8x8xf32>
    %138 = arith.mulf %137, %134 : vector<8x8xf32>
    %139 = arith.select %136, %134, %138 : vector<8x8xi1>, vector<8x8xf32>
    %140 = tpu.concatenate %19, %21, %23, %25, %27 in 1 : vector<8x2xf32>, vector<8x2xf32>, vector<8x2xf32>, vector<8x2xf32>, vector<8x2xf32> -> vector<8x10xf32>
    %cst_75 = arith.constant dense<0.000000e+00> : vector<8x8xf32>
    %141 = tpu.matmul %140, %38, %cst_75 {dimension_numbers = #tpu.dot_dimension_numbers<[1], [0], [0], [1], [0, 0, 1, 1], [], []>} : vector<8x10xf32>, vector<10x8xf32>, vector<8x8xf32> -> vector<8x8xf32>
    %142 = vector.broadcast %39 : vector<1x8xf32> to vector<8x8xf32>
    %143 = arith.addf %141, %142 : vector<8x8xf32>
    %cst_76 = arith.constant 0.000000e+00 : f32
    %144 = vector.broadcast %cst_76 : f32 to vector<8x8xf32>
    %145 = arith.cmpf oge, %143, %144 : vector<8x8xf32>
    %cst_77 = arith.constant 0.00999999977 : f32
    %146 = vector.broadcast %cst_77 : f32 to vector<8x8xf32>
    %147 = arith.mulf %146, %143 : vector<8x8xf32>
    %148 = arith.select %145, %143, %147 : vector<8x8xi1>, vector<8x8xf32>
    %149 = tpu.concatenate %21, %23, %25, %27, %29 in 1 : vector<8x2xf32>, vector<8x2xf32>, vector<8x2xf32>, vector<8x2xf32>, vector<8x2xf32> -> vector<8x10xf32>
    %cst_78 = arith.constant dense<0.000000e+00> : vector<8x8xf32>
    %150 = tpu.matmul %149, %38, %cst_78 {dimension_numbers = #tpu.dot_dimension_numbers<[1], [0], [0], [1], [0, 0, 1, 1], [], []>} : vector<8x10xf32>, vector<10x8xf32>, vector<8x8xf32> -> vector<8x8xf32>
    %151 = vector.broadcast %39 : vector<1x8xf32> to vector<8x8xf32>
    %152 = arith.addf %150, %151 : vector<8x8xf32>
    %cst_79 = arith.constant 0.000000e+00 : f32
    %153 = vector.broadcast %cst_79 : f32 to vector<8x8xf32>
    %154 = arith.cmpf oge, %152, %153 : vector<8x8xf32>
    %cst_80 = arith.constant 0.00999999977 : f32
    %155 = vector.broadcast %cst_80 : f32 to vector<8x8xf32>
    %156 = arith.mulf %155, %152 : vector<8x8xf32>
    %157 = arith.select %154, %152, %156 : vector<8x8xi1>, vector<8x8xf32>
    %158 = tpu.concatenate %23, %25, %27, %29, %31 in 1 : vector<8x2xf32>, vector<8x2xf32>, vector<8x2xf32>, vector<8x2xf32>, vector<8x2xf32> -> vector<8x10xf32>
    %cst_81 = arith.constant dense<0.000000e+00> : vector<8x8xf32>
    %159 = tpu.matmul %158, %38, %cst_81 {dimension_numbers = #tpu.dot_dimension_numbers<[1], [0], [0], [1], [0, 0, 1, 1], [], []>} : vector<8x10xf32>, vector<10x8xf32>, vector<8x8xf32> -> vector<8x8xf32>
    %160 = vector.broadcast %39 : vector<1x8xf32> to vector<8x8xf32>
    %161 = arith.addf %159, %160 : vector<8x8xf32>
    %cst_82 = arith.constant 0.000000e+00 : f32
    %162 = vector.broadcast %cst_82 : f32 to vector<8x8xf32>
    %163 = arith.cmpf oge, %161, %162 : vector<8x8xf32>
    %cst_83 = arith.constant 0.00999999977 : f32
    %164 = vector.broadcast %cst_83 : f32 to vector<8x8xf32>
    %165 = arith.mulf %164, %161 : vector<8x8xf32>
    %166 = arith.select %163, %161, %165 : vector<8x8xi1>, vector<8x8xf32>
    %167 = tpu.concatenate %25, %27, %29, %31, %33 in 1 : vector<8x2xf32>, vector<8x2xf32>, vector<8x2xf32>, vector<8x2xf32>, vector<8x2xf32> -> vector<8x10xf32>
    %cst_84 = arith.constant dense<0.000000e+00> : vector<8x8xf32>
    %168 = tpu.matmul %167, %38, %cst_84 {dimension_numbers = #tpu.dot_dimension_numbers<[1], [0], [0], [1], [0, 0, 1, 1], [], []>} : vector<8x10xf32>, vector<10x8xf32>, vector<8x8xf32> -> vector<8x8xf32>
    %169 = vector.broadcast %39 : vector<1x8xf32> to vector<8x8xf32>
    %170 = arith.addf %168, %169 : vector<8x8xf32>
    %cst_85 = arith.constant 0.000000e+00 : f32
    %171 = vector.broadcast %cst_85 : f32 to vector<8x8xf32>
    %172 = arith.cmpf oge, %170, %171 : vector<8x8xf32>
    %cst_86 = arith.constant 0.00999999977 : f32
    %173 = vector.broadcast %cst_86 : f32 to vector<8x8xf32>
    %174 = arith.mulf %173, %170 : vector<8x8xf32>
    %175 = arith.select %172, %170, %174 : vector<8x8xi1>, vector<8x8xf32>
    %176 = tpu.concatenate %27, %29, %31, %33, %35 in 1 : vector<8x2xf32>, vector<8x2xf32>, vector<8x2xf32>, vector<8x2xf32>, vector<8x2xf32> -> vector<8x10xf32>
    %cst_87 = arith.constant dense<0.000000e+00> : vector<8x8xf32>
    %177 = tpu.matmul %176, %38, %cst_87 {dimension_numbers = #tpu.dot_dimension_numbers<[1], [0], [0], [1], [0, 0, 1, 1], [], []>} : vector<8x10xf32>, vector<10x8xf32>, vector<8x8xf32> -> vector<8x8xf32>
    %178 = vector.broadcast %39 : vector<1x8xf32> to vector<8x8xf32>
    %179 = arith.addf %177, %178 : vector<8x8xf32>
    %cst_88 = arith.constant 0.000000e+00 : f32
    %180 = vector.broadcast %cst_88 : f32 to vector<8x8xf32>
    %181 = arith.cmpf oge, %179, %180 : vector<8x8xf32>
    %cst_89 = arith.constant 0.00999999977 : f32
    %182 = vector.broadcast %cst_89 : f32 to vector<8x8xf32>
    %183 = arith.mulf %182, %179 : vector<8x8xf32>
    %184 = arith.select %181, %179, %183 : vector<8x8xi1>, vector<8x8xf32>
    %185 = tpu.concatenate %29, %31, %33, %35, %37 in 1 : vector<8x2xf32>, vector<8x2xf32>, vector<8x2xf32>, vector<8x2xf32>, vector<8x2xf32> -> vector<8x10xf32>
    %cst_90 = arith.constant dense<0.000000e+00> : vector<8x8xf32>
    %186 = tpu.matmul %185, %38, %cst_90 {dimension_numbers = #tpu.dot_dimension_numbers<[1], [0], [0], [1], [0, 0, 1, 1], [], []>} : vector<8x10xf32>, vector<10x8xf32>, vector<8x8xf32> -> vector<8x8xf32>
    %187 = vector.broadcast %39 : vector<1x8xf32> to vector<8x8xf32>
    %188 = arith.addf %186, %187 : vector<8x8xf32>
    %cst_91 = arith.constant 0.000000e+00 : f32
    %189 = vector.broadcast %cst_91 : f32 to vector<8x8xf32>
    %190 = arith.cmpf oge, %188, %189 : vector<8x8xf32>
    %cst_92 = arith.constant 0.00999999977 : f32
    %191 = vector.broadcast %cst_92 : f32 to vector<8x8xf32>
    %192 = arith.mulf %191, %188 : vector<8x8xf32>
    %193 = arith.select %190, %188, %192 : vector<8x8xi1>, vector<8x8xf32>
    %c0_93 = arith.constant 0 : index
    %c0_94 = arith.constant 0 : index
    %194 = vector.load %arg4[%c0_93, %c0_94] : memref<40x32xf32, #tpu.memory_space<vmem>>, vector<40x32xf32>
    %c0_95 = arith.constant 0 : index
    %c0_96 = arith.constant 0 : index
    %195 = vector.load %arg5[%c0_95, %c0_96] : memref<1x32xf32, #tpu.memory_space<vmem>>, vector<1x32xf32>
    %196 = tpu.concatenate %49, %58, %67, %76, %85 in 1 : vector<8x8xf32>, vector<8x8xf32>, vector<8x8xf32>, vector<8x8xf32>, vector<8x8xf32> -> vector<8x40xf32>
    %cst_97 = arith.constant dense<0.000000e+00> : vector<8x32xf32>
    %197 = tpu.matmul %196, %194, %cst_97 {dimension_numbers = #tpu.dot_dimension_numbers<[1], [0], [0], [1], [0, 0, 1, 1], [], []>} : vector<8x40xf32>, vector<40x32xf32>, vector<8x32xf32> -> vector<8x32xf32>
    %198 = vector.broadcast %195 : vector<1x32xf32> to vector<8x32xf32>
    %199 = arith.addf %197, %198 : vector<8x32xf32>
    %cst_98 = arith.constant 0.000000e+00 : f32
    %200 = vector.broadcast %cst_98 : f32 to vector<8x32xf32>
    %201 = arith.cmpf oge, %199, %200 : vector<8x32xf32>
    %cst_99 = arith.constant 0.00999999977 : f32
    %202 = vector.broadcast %cst_99 : f32 to vector<8x32xf32>
    %203 = arith.mulf %202, %199 : vector<8x32xf32>
    %204 = arith.select %201, %199, %203 : vector<8x32xi1>, vector<8x32xf32>
    %205 = tpu.concatenate %67, %76, %85, %94, %103 in 1 : vector<8x8xf32>, vector<8x8xf32>, vector<8x8xf32>, vector<8x8xf32>, vector<8x8xf32> -> vector<8x40xf32>
    %cst_100 = arith.constant dense<0.000000e+00> : vector<8x32xf32>
    %206 = tpu.matmul %205, %194, %cst_100 {dimension_numbers = #tpu.dot_dimension_numbers<[1], [0], [0], [1], [0, 0, 1, 1], [], []>} : vector<8x40xf32>, vector<40x32xf32>, vector<8x32xf32> -> vector<8x32xf32>
    %207 = vector.broadcast %195 : vector<1x32xf32> to vector<8x32xf32>
    %208 = arith.addf %206, %207 : vector<8x32xf32>
    %cst_101 = arith.constant 0.000000e+00 : f32
    %209 = vector.broadcast %cst_101 : f32 to vector<8x32xf32>
    %210 = arith.cmpf oge, %208, %209 : vector<8x32xf32>
    %cst_102 = arith.constant 0.00999999977 : f32
    %211 = vector.broadcast %cst_102 : f32 to vector<8x32xf32>
    %212 = arith.mulf %211, %208 : vector<8x32xf32>
    %213 = arith.select %210, %208, %212 : vector<8x32xi1>, vector<8x32xf32>
    %214 = tpu.concatenate %85, %94, %103, %112, %121 in 1 : vector<8x8xf32>, vector<8x8xf32>, vector<8x8xf32>, vector<8x8xf32>, vector<8x8xf32> -> vector<8x40xf32>
    %cst_103 = arith.constant dense<0.000000e+00> : vector<8x32xf32>
    %215 = tpu.matmul %214, %194, %cst_103 {dimension_numbers = #tpu.dot_dimension_numbers<[1], [0], [0], [1], [0, 0, 1, 1], [], []>} : vector<8x40xf32>, vector<40x32xf32>, vector<8x32xf32> -> vector<8x32xf32>
    %216 = vector.broadcast %195 : vector<1x32xf32> to vector<8x32xf32>
    %217 = arith.addf %215, %216 : vector<8x32xf32>
    %cst_104 = arith.constant 0.000000e+00 : f32
    %218 = vector.broadcast %cst_104 : f32 to vector<8x32xf32>
    %219 = arith.cmpf oge, %217, %218 : vector<8x32xf32>
    %cst_105 = arith.constant 0.00999999977 : f32
    %220 = vector.broadcast %cst_105 : f32 to vector<8x32xf32>
    %221 = arith.mulf %220, %217 : vector<8x32xf32>
    %222 = arith.select %219, %217, %221 : vector<8x32xi1>, vector<8x32xf32>
    %223 = tpu.concatenate %103, %112, %121, %130, %139 in 1 : vector<8x8xf32>, vector<8x8xf32>, vector<8x8xf32>, vector<8x8xf32>, vector<8x8xf32> -> vector<8x40xf32>
    %cst_106 = arith.constant dense<0.000000e+00> : vector<8x32xf32>
    %224 = tpu.matmul %223, %194, %cst_106 {dimension_numbers = #tpu.dot_dimension_numbers<[1], [0], [0], [1], [0, 0, 1, 1], [], []>} : vector<8x40xf32>, vector<40x32xf32>, vector<8x32xf32> -> vector<8x32xf32>
    %225 = vector.broadcast %195 : vector<1x32xf32> to vector<8x32xf32>
    %226 = arith.addf %224, %225 : vector<8x32xf32>
    %cst_107 = arith.constant 0.000000e+00 : f32
    %227 = vector.broadcast %cst_107 : f32 to vector<8x32xf32>
    %228 = arith.cmpf oge, %226, %227 : vector<8x32xf32>
    %cst_108 = arith.constant 0.00999999977 : f32
    %229 = vector.broadcast %cst_108 : f32 to vector<8x32xf32>
    %230 = arith.mulf %229, %226 : vector<8x32xf32>
    %231 = arith.select %228, %226, %230 : vector<8x32xi1>, vector<8x32xf32>
    %232 = tpu.concatenate %121, %130, %139, %148, %157 in 1 : vector<8x8xf32>, vector<8x8xf32>, vector<8x8xf32>, vector<8x8xf32>, vector<8x8xf32> -> vector<8x40xf32>
    %cst_109 = arith.constant dense<0.000000e+00> : vector<8x32xf32>
    %233 = tpu.matmul %232, %194, %cst_109 {dimension_numbers = #tpu.dot_dimension_numbers<[1], [0], [0], [1], [0, 0, 1, 1], [], []>} : vector<8x40xf32>, vector<40x32xf32>, vector<8x32xf32> -> vector<8x32xf32>
    %234 = vector.broadcast %195 : vector<1x32xf32> to vector<8x32xf32>
    %235 = arith.addf %233, %234 : vector<8x32xf32>
    %cst_110 = arith.constant 0.000000e+00 : f32
    %236 = vector.broadcast %cst_110 : f32 to vector<8x32xf32>
    %237 = arith.cmpf oge, %235, %236 : vector<8x32xf32>
    %cst_111 = arith.constant 0.00999999977 : f32
    %238 = vector.broadcast %cst_111 : f32 to vector<8x32xf32>
    %239 = arith.mulf %238, %235 : vector<8x32xf32>
    %240 = arith.select %237, %235, %239 : vector<8x32xi1>, vector<8x32xf32>
    %241 = tpu.concatenate %139, %148, %157, %166, %175 in 1 : vector<8x8xf32>, vector<8x8xf32>, vector<8x8xf32>, vector<8x8xf32>, vector<8x8xf32> -> vector<8x40xf32>
    %cst_112 = arith.constant dense<0.000000e+00> : vector<8x32xf32>
    %242 = tpu.matmul %241, %194, %cst_112 {dimension_numbers = #tpu.dot_dimension_numbers<[1], [0], [0], [1], [0, 0, 1, 1], [], []>} : vector<8x40xf32>, vector<40x32xf32>, vector<8x32xf32> -> vector<8x32xf32>
    %243 = vector.broadcast %195 : vector<1x32xf32> to vector<8x32xf32>
    %244 = arith.addf %242, %243 : vector<8x32xf32>
    %cst_113 = arith.constant 0.000000e+00 : f32
    %245 = vector.broadcast %cst_113 : f32 to vector<8x32xf32>
    %246 = arith.cmpf oge, %244, %245 : vector<8x32xf32>
    %cst_114 = arith.constant 0.00999999977 : f32
    %247 = vector.broadcast %cst_114 : f32 to vector<8x32xf32>
    %248 = arith.mulf %247, %244 : vector<8x32xf32>
    %249 = arith.select %246, %244, %248 : vector<8x32xi1>, vector<8x32xf32>
    %250 = tpu.concatenate %157, %166, %175, %184, %193 in 1 : vector<8x8xf32>, vector<8x8xf32>, vector<8x8xf32>, vector<8x8xf32>, vector<8x8xf32> -> vector<8x40xf32>
    %cst_115 = arith.constant dense<0.000000e+00> : vector<8x32xf32>
    %251 = tpu.matmul %250, %194, %cst_115 {dimension_numbers = #tpu.dot_dimension_numbers<[1], [0], [0], [1], [0, 0, 1, 1], [], []>} : vector<8x40xf32>, vector<40x32xf32>, vector<8x32xf32> -> vector<8x32xf32>
    %252 = vector.broadcast %195 : vector<1x32xf32> to vector<8x32xf32>
    %253 = arith.addf %251, %252 : vector<8x32xf32>
    %cst_116 = arith.constant 0.000000e+00 : f32
    %254 = vector.broadcast %cst_116 : f32 to vector<8x32xf32>
    %255 = arith.cmpf oge, %253, %254 : vector<8x32xf32>
    %cst_117 = arith.constant 0.00999999977 : f32
    %256 = vector.broadcast %cst_117 : f32 to vector<8x32xf32>
    %257 = arith.mulf %256, %253 : vector<8x32xf32>
    %258 = arith.select %255, %253, %257 : vector<8x32xi1>, vector<8x32xf32>
    %c0_118 = arith.constant 0 : index
    %c0_119 = arith.constant 0 : index
    %259 = vector.load %arg6[%c0_118, %c0_119] : memref<160x128xf32, #tpu.memory_space<vmem>>, vector<160x128xf32>
    %c0_120 = arith.constant 0 : index
    %c0_121 = arith.constant 0 : index
    %260 = vector.load %arg7[%c0_120, %c0_121] : memref<1x128xf32, #tpu.memory_space<vmem>>, vector<1x128xf32>
    %261 = tpu.concatenate %204, %213, %222, %231, %240 in 1 : vector<8x32xf32>, vector<8x32xf32>, vector<8x32xf32>, vector<8x32xf32>, vector<8x32xf32> -> vector<8x160xf32>
    %cst_122 = arith.constant dense<0.000000e+00> : vector<8x128xf32>
    %262 = tpu.matmul %261, %259, %cst_122 {dimension_numbers = #tpu.dot_dimension_numbers<[1], [0], [0], [1], [0, 0, 1, 1], [], []>} : vector<8x160xf32>, vector<160x128xf32>, vector<8x128xf32> -> vector<8x128xf32>
    %263 = vector.broadcast %260 : vector<1x128xf32> to vector<8x128xf32>
    %264 = arith.addf %262, %263 : vector<8x128xf32>
    %cst_123 = arith.constant 0.000000e+00 : f32
    %265 = vector.broadcast %cst_123 : f32 to vector<8x128xf32>
    %266 = arith.cmpf oge, %264, %265 : vector<8x128xf32>
    %cst_124 = arith.constant 0.00999999977 : f32
    %267 = vector.broadcast %cst_124 : f32 to vector<8x128xf32>
    %268 = arith.mulf %267, %264 : vector<8x128xf32>
    %269 = arith.select %266, %264, %268 : vector<8x128xi1>, vector<8x128xf32>
    %270 = tpu.concatenate %222, %231, %240, %249, %258 in 1 : vector<8x32xf32>, vector<8x32xf32>, vector<8x32xf32>, vector<8x32xf32>, vector<8x32xf32> -> vector<8x160xf32>
    %cst_125 = arith.constant dense<0.000000e+00> : vector<8x128xf32>
    %271 = tpu.matmul %270, %259, %cst_125 {dimension_numbers = #tpu.dot_dimension_numbers<[1], [0], [0], [1], [0, 0, 1, 1], [], []>} : vector<8x160xf32>, vector<160x128xf32>, vector<8x128xf32> -> vector<8x128xf32>
    %272 = vector.broadcast %260 : vector<1x128xf32> to vector<8x128xf32>
    %273 = arith.addf %271, %272 : vector<8x128xf32>
    %cst_126 = arith.constant 0.000000e+00 : f32
    %274 = vector.broadcast %cst_126 : f32 to vector<8x128xf32>
    %275 = arith.cmpf oge, %273, %274 : vector<8x128xf32>
    %cst_127 = arith.constant 0.00999999977 : f32
    %276 = vector.broadcast %cst_127 : f32 to vector<8x128xf32>
    %277 = arith.mulf %276, %273 : vector<8x128xf32>
    %278 = arith.select %275, %273, %277 : vector<8x128xi1>, vector<8x128xf32>
    %c0_128 = arith.constant 0 : index
    %c0_129 = arith.constant 0 : index
    %279 = vector.load %arg8[%c0_128, %c0_129] : memref<512x256xf32, #tpu.memory_space<vmem>>, vector<512x256xf32>
    %c0_130 = arith.constant 0 : index
    %c0_131 = arith.constant 0 : index
    %280 = vector.load %arg9[%c0_130, %c0_131] : memref<1x256xf32, #tpu.memory_space<vmem>>, vector<1x256xf32>
    %cst_132 = arith.constant 0.000000e+00 : f32
    %281 = vector.broadcast %cst_132 : f32 to vector<8x128xf32>
    %282 = tpu.concatenate %281, %269, %278, %281 in 1 : vector<8x128xf32>, vector<8x128xf32>, vector<8x128xf32>, vector<8x128xf32> -> vector<8x512xf32>
    %cst_133 = arith.constant dense<0.000000e+00> : vector<8x256xf32>
    %283 = tpu.matmul %282, %279, %cst_133 {dimension_numbers = #tpu.dot_dimension_numbers<[1], [0], [0], [1], [0, 0, 1, 1], [], []>} : vector<8x512xf32>, vector<512x256xf32>, vector<8x256xf32> -> vector<8x256xf32>
    %284 = vector.broadcast %280 : vector<1x256xf32> to vector<8x256xf32>
    %285 = arith.addf %283, %284 : vector<8x256xf32>
    %cst_134 = arith.constant 0.000000e+00 : f32
    %286 = vector.broadcast %cst_134 : f32 to vector<8x256xf32>
    %287 = arith.cmpf oge, %285, %286 : vector<8x256xf32>
    %cst_135 = arith.constant 0.00999999977 : f32
    %288 = vector.broadcast %cst_135 : f32 to vector<8x256xf32>
    %289 = arith.mulf %288, %285 : vector<8x256xf32>
    %290 = arith.select %287, %285, %289 : vector<8x256xi1>, vector<8x256xf32>
    %c0_136 = arith.constant 0 : index
    %c0_137 = arith.constant 0 : index
    %291 = vector.load %arg10[%c0_136, %c0_137] : memref<8x256xf32, #tpu.memory_space<vmem>>, vector<8x256xf32>
    tpu.vector_store %arg10[%c0_136, %c0_137], %290 {strides = array<i32>} : memref<8x256xf32, #tpu.memory_space<vmem>>, vector<8x256xf32>,
    return
  }
  func.func @transform_0(%arg0: i32) -> (i32, i32, i32) {
    %c0_i32 = arith.constant 0 : i32
    %c0_i32_0 = arith.constant 0 : i32
    %c0_i32_1 = arith.constant 0 : i32
    return %c0_i32, %arg0, %c0_i32_0 : i32, i32, i32
  }
  func.func @transform_1(%arg0: i32) -> (i32, i32) {
    %c0_i32 = arith.constant 0 : i32
    %c0_i32_0 = arith.constant 0 : i32
    %c0_i32_1 = arith.constant 0 : i32
    return %c0_i32, %c0_i32_0 : i32, i32
  }
  func.func @transform_2(%arg0: i32) -> (i32, i32) {
    %c0_i32 = arith.constant 0 : i32
    %c0_i32_0 = arith.constant 0 : i32
    %c0_i32_1 = arith.constant 0 : i32
    return %c0_i32, %c0_i32_0 : i32, i32
  }
  func.func @transform_3(%arg0: i32) -> (i32, i32) {
    %c0_i32 = arith.constant 0 : i32
    %c0_i32_0 = arith.constant 0 : i32
    %c0_i32_1 = arith.constant 0 : i32
    return %c0_i32, %c0_i32_0 : i32, i32
  }
  func.func @transform_4(%arg0: i32) -> (i32, i32) {
    %c0_i32 = arith.constant 0 : i32
    %c0_i32_0 = arith.constant 0 : i32
    %c0_i32_1 = arith.constant 0 : i32
    return %c0_i32, %c0_i32_0 : i32, i32
  }
  func.func @transform_5(%arg0: i32) -> (i32, i32) {
    %c0_i32 = arith.constant 0 : i32
    %c0_i32_0 = arith.constant 0 : i32
    %c0_i32_1 = arith.constant 0 : i32
    return %c0_i32, %c0_i32_0 : i32, i32
  }
  func.func @transform_6(%arg0: i32) -> (i32, i32) {
    %c0_i32 = arith.constant 0 : i32
    %c0_i32_0 = arith.constant 0 : i32
    %c0_i32_1 = arith.constant 0 : i32
    return %c0_i32, %c0_i32_0 : i32, i32
  }
  func.func @transform_7(%arg0: i32) -> (i32, i32) {
    %c0_i32 = arith.constant 0 : i32
    %c0_i32_0 = arith.constant 0 : i32
    %c0_i32_1 = arith.constant 0 : i32
    return %c0_i32, %c0_i32_0 : i32, i32
  }
  func.func @transform_8(%arg0: i32) -> (i32, i32) {
    %c0_i32 = arith.constant 0 : i32
    %c0_i32_0 = arith.constant 0 : i32
    %c0_i32_1 = arith.constant 0 : i32
    return %c0_i32, %c0_i32_0 : i32, i32
  }
  func.func @transform_9(%arg0: i32) -> (i32, i32) {
    %c0_i32 = arith.constant 0 : i32
    %c0_i32_0 = arith.constant 0 : i32
    return %arg0, %c0_i32 : i32, i32
  }
}

</mosaic_0001>

<bundles_post_ra>
// kernel: discriminator_forward.1
= control target key start
LH: loop header
LB: loop body
LE: loop exit
PB: predicated region body
PF: predicated region fallthrough
CT: control target
= control target key end

     0   :  { %14 = vsyncpa [#allocation4], 0  ;;  %s5494_s0 = inlined_call_operand.vmem [shape: f32[20,16,2], index: 0, kind: input, shape index: {}]   ;;  %s5495_s1 = inlined_call_operand.vmem [shape: f32[10,8], index: 1, kind: input, shape index: {}]   ;;  %s5496_s2 = inlined_call_operand.vmem [shape: f32[1,8], index: 2, kind: input, shape index: {}]   ;;  %s5497_s3 = inlined_call_operand.vmem [shape: f32[40,32], index: 3, kind: input, shape index: {}]   ;;  %s5498_s4 = inlined_call_operand.vmem [shape: f32[1,32], index: 4, kind: input, shape index: {}]   ;;  %s5499_s5 = inlined_call_operand.hbm [shape: f32[160,128], index: 5, kind: input, shape index: {}]   ;;  %s5500_s6 = inlined_call_operand.vmem [shape: f32[1,128], index: 6, kind: input, shape index: {}]   ;;  %s5501_s7 = inlined_call_operand.vmem [shape: f32[512,256], index: 7, kind: input, shape index: {}]   ;;  %s5502_s8 = inlined_call_operand.vmem [shape: f32[1,256], index: 8, kind: input, shape index: {}]   ;;  %s5503_s9 = inlined_call_operand.hbm [shape: f32[16,256], index: 9, kind: output, shape index: {}]  }
   0x1   :  { %15 = vsyncpa [#allocation5], 0 }
   0x2   :  { %17 = vsyncpa [#allocation5 + $0x1], 0  ;;  %s4275_s30 = smov 0   ;;  %s4277_s10 = smov 0  }
   0x3   :  { %s4279_s11 = smov 0   ;;  %s4281_s12 = smov 0  }
   0x4 LB: > { %s4296_s13 = sadd.s32 4294967295, %s4206_s12   ;;  %s3357_s14 = sadd.s32 4294967294, %s4206_s12   ;;  %s4206_s12 = sphi %s4281_s12, %s5525_s12   ;;  %s4202_s11 = sphi %s4279_s11, %s5524_s11   ;;  %s4198_s10 = sphi %s4277_s10, %s5523_s10   ;;  %s4194_s30 = sphi %s4275_s30, %s5522_s30  }
   0x5   : > { %s4300_s15 = sadd.s32 1, %s4206_s12   ;;  %s30_s16 = sadd.s32 1, %s4202_s11 }
   0x6   : > { %s27_s17 = ssub.s32 %s4206_s12, %s4300_s15  ;;  %p37_p0 = scmp.ne.s32.totalorder %s4202_s11, %s4198_s10 }
   0x7   : > { %p28_p1 = scmp.eq.s32.totalorder %s27_s17, 0  ;;  %p38_p2 = scmp.eq.s32.totalorder %s4206_s12, 0 }
   0x8   : > { %p235_p3 = scmp.eq.s32.totalorder %s4296_s13, 1  ;;  %p240_p4 = scmp.ne.s32.totalorder %s4198_s10, %s4194_s30 }
   0x9   : > { %s4312_s18 = scalar_select %p28_p1, %s4202_s11, %s30_s16  }
   0xa   : > { %p4314_p5 = por %p38_p2, %p37_p0  ;;  %p4318_p6 = por %p235_p3, %p37_p0 }
   0xb   : > { %5507 = sst [smem:[#allocation9_spill]] %s4312_s18  ;;  %p241_p7 = scmp.eq.s32.totalorder %s3357_s14, 1 }
   0xc   : > { %s5508_s19 = scalar_select %p4314_p5, 1, 0 }
   0xd   : > { %s5509_s20 = scalar_select %p4318_p6, 1, 0 }
   0xe   : > { %p3358_p8 = scmp.ge.s32.totalorder %s4206_s12, 1  ;;  %p248_p9 = scmp.lt.s32.totalorder %s4206_s12, 3 }
   0xf   : > { %p4324_p10 = por %p241_p7, %p240_p4  ;;  %p5504_p11 = scmp.eq.s32.totalorder %s4296_s13, 0 }
  0x10   : > { %p4329_p12 = pnand %p3358_p8, %p248_p9  ;;  %s4208_s23 = smov [#allocation3]  }
  0x11   : > { %s5510_s21 = scalar_select %p4324_p10, 1, 0 }
  0x12   : > { %s5511_s22 = scalar_select %p4329_p12, 1, 0 }
  0x13   : > { %s272_s24 = sshll.u32 %s4208_s23, 4  ;;  %p4048_p13 = pneg %p4329_p12  ;;  %s273_s24 = int_to_ptr.vmem [resolvable:$true] %s272_s24 }
  0x14   : > { %s4112_s28 = scalar_lea.hbm %s5499_s5, 2560 }
  0x15   : > { %p4337_p0 = pnand %p5504_p11, %p4048_p13  ;;  %p4113_p1 = scmp.ne.s32.totalorder %s5499_s5, %s4112_s28 }
  0x16   : > { %p4119_p7 = scmp.lt.u32.totalorder %s4112_s28, %s5499_s5 }
  0x17   : > { %p4114_p2 = pneg %p4337_p0 }
  0x19   : > { %p4115_p3 = pnand %p4114_p2, %p4113_p1 }
  0x1b   : > { %p4116_p4 = pneg %p4115_p3 }
  0x1d   : > { %p4121_p8 = pnand %p4119_p7, %p4116_p4 }
  0x1f   : > { %4124 = shalt.err (!%p4121_p8)
}
  0x20   : > { %s4125_s23 = scalar_lea.vmem %s273_s24, 2560  ;;  %p4133_p10 = scmp.lt.s32.totalorder %s273_s24, %s273_s24 }
  0x21   : > { %p4126_p9 = scmp.ne.s32.totalorder %s273_s24, %s4125_s23  ;;  %p4134_p6 = scmp.lt.s32.totalorder %s4125_s23, %s4125_s23 }
  0x23   : > { %p4128_p13 = pnand %p4126_p9, %p4114_p2  ;;  %p4135_p12 = por %p4134_p6, %p4133_p10 }
  0x25   : > { %p4129_p11 = pneg %p4128_p13 }
  0x27   : > { %p4136_p5 = pnand %p4135_p12, %p4129_p11 }
  0x29   : > { %4139 = shalt.err (!%p4136_p5)
}
  0x2a   : > { %s4209_s26 = smov 128   ;;  %s4210_s27 = smov 8  }
  0x2b   : > { %4051 = dma.hbm_to_vmem [thread:$0]  (!%p4337_p0), %s5499_s5, 2560, %s273_s24, [#allocation4], %s4209_s26, %s4209_s26, %s4210_s27  }
  0x2c   : > { %p3360_p1 = scmp.ge.s32.totalorder %s4206_s12, 2 }
  0x2d   : > { %p5513_p2 = scmp.ne.s32.totalorder (!%p3360_p1), %s5508_s19, 0 }
  0x2e   : > { %291 = sbr.rel (%p3360_p1) target bundleno = 67 (0x43), region = 48 }
  0x35   : > { %294 = sbr.rel (!%p5513_p2) target bundleno = 67 (0x43), region = 52  ;;  %s296_s28 = sand.u32 (%p5513_p2), 1, %s4202_s11  }
  0x36   : > { %s3361_s16 = sshll.u32 (%p5513_p2), %s4206_s12, 3  ;;  %s4040_s17 = smul.u32 (%p5513_p2), 160, %s296_s28 }
  0x37   : > { %s4367_s25 = scalar_lea.vmem (%p5513_p2), %s5494_s0, %s3361_s16 }
  0x38   : > { %v366_v0 = vld [vmem:[%s4367_s25] sm:$0xff] (%p5513_p2)  ;;  %v368_v1 = vld [vmem:[%s4367_s25 + $0x10] sm:$0xff] (%p5513_p2)  ;;  %s4375_s18 = scalar_lea.vmem (%p5513_p2), [#allocation2], %s4040_s17 }
  0x39   : > { %v370_v2 = vld [vmem:[%s4367_s25 + $0x20] sm:$0xff] (%p5513_p2)  ;;  %v372_v3 = vld [vmem:[%s4367_s25 + $0x30] sm:$0xff] (%p5513_p2)  ;;  %367 = vst [vmem:[%s4375_s18] sm:$0xff] (%p5513_p2), %v366_v0  ;;  %369 = vst [vmem:[%s4375_s18 + $0x8] sm:$0xff] (%p5513_p2), %v368_v1 }
  0x3a   : > { %v374_v4 = vld [vmem:[%s4367_s25 + $0x40] sm:$0xff] (%p5513_p2)  ;;  %v376_v5 = vld [vmem:[%s4367_s25 + $0x50] sm:$0xff] (%p5513_p2)  ;;  %371 = vst [vmem:[%s4375_s18 + $0x10] sm:$0xff] (%p5513_p2), %v370_v2  ;;  %373 = vst [vmem:[%s4375_s18 + $0x18] sm:$0xff] (%p5513_p2), %v372_v3 }
  0x3b   : > { %375 = vst [vmem:[%s4375_s18 + $0x20] sm:$0xff] (%p5513_p2), %v374_v4  ;;  %377 = vst [vmem:[%s4375_s18 + $0x28] sm:$0xff] (%p5513_p2), %v376_v5  ;;  %v378_v6 = vld [vmem:[%s4367_s25 + $0x60] sm:$0xff] (%p5513_p2)  ;;  %v380_v7 = vld [vmem:[%s4367_s25 + $0x70] sm:$0xff] (%p5513_p2) }
  0x3c   : > { %v382_v8 = vld [vmem:[%s4367_s25 + $0x80] sm:$0xff]  ;;  %379 = vst [vmem:[%s4375_s18 + $0x30] sm:$0xff] %v378_v6  ;;  %381 = vst [vmem:[%s4375_s18 + $0x38] sm:$0xff] %v380_v7  ;;  %v384_v9 = vld [vmem:[%s4367_s25 + $0x90] sm:$0xff] }
  0x3d   : > { %383 = vst [vmem:[%s4375_s18 + $0x40] sm:$0xff] %v382_v8  ;;  %v386_v10 = vld [vmem:[%s4367_s25 + $0xa0] sm:$0xff]  ;;  %v388_v11 = vld [vmem:[%s4367_s25 + $0xb0] sm:$0xff]  ;;  %385 = vst [vmem:[%s4375_s18 + $0x48] sm:$0xff] %v384_v9 }
  0x3e   : > { %387 = vst [vmem:[%s4375_s18 + $0x50] sm:$0xff] %v386_v10  ;;  %389 = vst [vmem:[%s4375_s18 + $0x58] sm:$0xff] %v388_v11  ;;  %v390_v12 = vld [vmem:[%s4367_s25 + $0xc0] sm:$0xff]  ;;  %v392_v13 = vld [vmem:[%s4367_s25 + $0xd0] sm:$0xff] }
  0x3f   : > { %v394_v14 = vld [vmem:[%s4367_s25 + $0xe0] sm:$0xff]  ;;  %391 = vst [vmem:[%s4375_s18 + $0x60] sm:$0xff] %v390_v12  ;;  %393 = vst [vmem:[%s4375_s18 + $0x68] sm:$0xff] %v392_v13  ;;  %v396_v15 = vld [vmem:[%s4367_s25 + $0xf0] sm:$0xff] }
  0x40   : > { %395 = vst [vmem:[%s4375_s18 + $0x70] sm:$0xff] %v394_v14  ;;  %v398_v16 = vld [vmem:[%s4367_s25 + $0x100] sm:$0xff]  ;;  %v400_v17 = vld [vmem:[%s4367_s25 + $0x110] sm:$0xff]  ;;  %397 = vst [vmem:[%s4375_s18 + $0x78] sm:$0xff] %v396_v15 }
  0x41   : > { %399 = vst [vmem:[%s4375_s18 + $0x80] sm:$0xff] %v398_v16  ;;  %401 = vst [vmem:[%s4375_s18 + $0x88] sm:$0xff] %v400_v17  ;;  %v402_v18 = vld [vmem:[%s4367_s25 + $0x120] sm:$0xff]  ;;  %v404_v19 = vld [vmem:[%s4367_s25 + $0x130] sm:$0xff] }
  0x42   : > { %403 = vst [vmem:[%s4375_s18 + $0x90] sm:$0xff] %v402_v18  ;;  %405 = vst [vmem:[%s4375_s18 + $0x98] sm:$0xff] %v404_v19 }
  0x43 PF: > { %p5514_p5 = scmp.ne.s32.totalorder %s5511_s22, 0 }
  0x44   : > { %s4414_s19 = sand.u32 (!%p5514_p5), 1, %s4198_s10   ;;  %p5515_p6 = scmp.eq.s32.totalorder (!%p5514_p5), %s4296_s13, 0 }
  0x45   : > { %414 = sbr.rel (%p5514_p5) target bundleno = 1427 (0x593), region = 90 }
  0x46   : > { %s4041_s24 = smul.u32 (!%p5514_p5), 160, %s4414_s19 }
  0x48   : > { %s4417_s26 = scalar_lea.vmem (!%p5514_p5), [#allocation2], %s4041_s24 }
  0x4c   : > { %4185 = dma.done.wait (%p5515_p6), [#allocation4], 2560   ;;  %p5516_p10 = pmov %p5515_p6 }
  0x4d   : > { %v4211_v20 = vmov 0.0|0.0   ;;  %vm4212_vm0 = vmmov 0   ;;  %v4213_v21 = vmov 0.0   ;;  %v4430_v22 = vld [vmem:[%s4417_s26 + $0x10] sm:$0xff]  ;;  %v4433_v23 = vld [vmem:[%s4417_s26] sm:$0xff]  ;;  %s4214_s22 = smov 8  }
  0x4e   : > { %4187 = vsyncadd (%p5516_p10), [#allocation4], 4294964736  ;;  %3738 = vmatprep.subr.bf16.mxu0 %v4211_v20  ;;  %3750 = vmatprep.subr.bf16.mxu1 %v4211_v20  ;;  %s4215_s27 = smov 4   ;;  %v4440_v24 = vld [vmem:[%s4417_s26 + $0x8] sm:$0xff]  ;;  %vm524_vm1 = vcmask 1041408   ;;  %s4216_s29 = smov 2  }
  0x4f   : > { %3532 = vmatprep.mubr.msk.f32.mxu0 %vm4212_vm0, %v4213_v21  ;;  %3553 = vmatprep.mubr.msk.f32.mxu1 %vm4212_vm0, %v4213_v21  ;;  %s4217_s14 = smov 6   ;;  %v493_v25 = vld [vmem:[%s5495_s1] sm:$0xff]  ;;  %v494_v26 = vld [vmem:[%s5495_s1 + $0x8] sm:$0x3]  ;;  %vm4218_vm2 = vmmov 1   ;;  %v4463_v29 = vld [vmem:[%s4417_s26 + $0x18] sm:$0xff] }
  0x50   : > { %505 = vrot.lane.b32.xlu1 %v4430_v22, %s4214_s22  ;;  %497 = vrot.lane.b32.xlu0 %v4433_v23, %s4215_s27  ;;  %v4452_v27 = vpack.c.bf16 %v494_v26, %v493_v25  ;;  %vm4454_vm3 = vmpackc.low %vm524_vm1, %vm4218_vm2  ;;  %v4482_v30 = vld [vmem:[%s4417_s26 + $0x20] sm:$0xff]  ;;  %v4497_v31 = vld [vmem:[%s4417_s26 + $0x28] sm:$0xff]  ;;  %vm508_vm4 = vcmask 31744   ;;  %vm510_vm5 = vcmask 48128   ;;  %vm614_vm6 = vcmask 15360   ;;  %s4219_s24 = smov 24  }
  0x51   : > { %v4504_v32 = vld [vmem:[%s4417_s26 + $0x30] sm:$0xff]  ;;  %v4519_v33 = vld [vmem:[%s4417_s26 + $0x38] sm:$0xff]  ;;  %v4526_v34 = vld [vmem:[%s4417_s26 + $0x40] sm:$0xff]  ;;  %vm512_vm7 = vcmask 64512   ;;  %vm520_vm8 = vcmask 80896   ;;  %p5519_p12 = scmp.ne.s32.totalorder %s5509_s20, 0 }
  0x52   : > { %3741 = vmatpush3.bf16.msk.msra.mxu0 %vm4454_vm3, %v4452_v27  ;;  %3753 = vmatpush3.bf16.msk.msra.mxu1 %vm4454_vm3, %v4452_v27  ;;  %v4541_v35 = vld [vmem:[%s4417_s26 + $0x48] sm:$0xff]  ;;  %v4548_v36 = vld [vmem:[%s4417_s26 + $0x50] sm:$0xff]  ;;  %v4563_v37 = vld [vmem:[%s4417_s26 + $0x58] sm:$0xff]  ;;  %s4224_s25 = smov [#allocation6]  }
  0x53   : > { %3742 = vmatprep.subr.bf16.mxu0 %v4211_v20  ;;  %3758 = vmatprep.subr.bf16.mxu1 %v4211_v20  ;;  %v4570_v38 = vld [vmem:[%s4417_s26 + $0x60] sm:$0xff]  ;;  %v4585_v39 = vld [vmem:[%s4417_s26 + $0x68] sm:$0xff]  ;;  %v4592_v40 = vld [vmem:[%s4417_s26 + $0x70] sm:$0xff]  ;;  %s4144_s18 = sshll.u32 %s4224_s25, 4  ;;  %s4145_s18 = int_to_ptr.vmem [resolvable:$false] %s4144_s18 }
  0x54   : > { %601 = vrot.lane.b32.xlu1 %v4433_v23, %s4216_s29  ;;  %501 = vrot.lane.b32.xlu0 %v4440_v24, %s4217_s14  ;;  %v3379_v41 = vld [vmem:[%s4417_s26 + $0x78] sm:$0xff]  ;;  %v3380_v42 = vld [vmem:[%s4417_s26 + $0x80] sm:$0xff] }
  0x55   : > { %v3381_v54 = vld [vmem:[%s4417_s26 + $0x88] sm:$0xff]  ;;  %v3382_v60 = vld [vmem:[%s4417_s26 + $0x90] sm:$0xff]  ;;  %s4220_s26 = smov 16  }
  0x58   : > { %607 = vrot.lane.b32.xlu1 %v4430_v22, %s4217_s14  ;;  %604 = vrot.lane.b32.xlu0 %v4440_v24, %s4215_s27 }
  0x5c   : > { %695 = vrot.lane.b32.xlu1 %v4440_v24, %s4216_s29  ;;  %611 = vrot.lane.b32.xlu0 %v4463_v29, %s4214_s22 }
  0x60   : > { %701 = vrot.lane.b32.xlu1 %v4463_v29, %s4217_s14  ;;  %698 = vrot.lane.b32.xlu0 %v4430_v22, %s4215_s27 }
  0x64   : > { %788 = vrot.lane.b32.xlu1 %v4430_v22, %s4216_s29  ;;  %705 = vrot.lane.b32.xlu0 %v4482_v30, %s4214_s22 }
  0x68   : > { %881 = vrot.lane.b32.xlu1 %v4463_v29, %s4216_s29  ;;  %791 = vrot.lane.b32.xlu0 %v4463_v29, %s4215_s27 }
  0x6c   : > { %884 = vrot.lane.b32.xlu1 %v4482_v30, %s4215_s27  ;;  %794 = vrot.lane.b32.xlu0 %v4482_v30, %s4217_s14 }
  0x70   : > { %887 = vrot.lane.b32.xlu1 %v4497_v31, %s4217_s14  ;;  %798 = vrot.lane.b32.xlu0 %v4497_v31, %s4214_s22 }
  0x74   : > { %974 = vrot.lane.b32.xlu1 %v4482_v30, %s4216_s29  ;;  %891 = vrot.lane.b32.xlu0 %v4504_v32, %s4214_s22 }
  0x78   : > { %1067 = vrot.lane.b32.xlu1 %v4497_v31, %s4216_s29  ;;  %977 = vrot.lane.b32.xlu0 %v4497_v31, %s4215_s27 }
  0x7c   : > { %1070 = vrot.lane.b32.xlu1 %v4504_v32, %s4215_s27  ;;  %980 = vrot.lane.b32.xlu0 %v4504_v32, %s4217_s14 }
  0x80   : > { %1073 = vrot.lane.b32.xlu1 %v4519_v33, %s4217_s14  ;;  %984 = vrot.lane.b32.xlu0 %v4519_v33, %s4214_s22 }
  0x84   : > { %1160 = vrot.lane.b32.xlu1 %v4504_v32, %s4216_s29  ;;  %1077 = vrot.lane.b32.xlu0 %v4526_v34, %s4214_s22 }
  0x88   : > { %1253 = vrot.lane.b32.xlu1 %v4519_v33, %s4216_s29  ;;  %1163 = vrot.lane.b32.xlu0 %v4519_v33, %s4215_s27 }
  0x8c   : > { %1256 = vrot.lane.b32.xlu1 %v4526_v34, %s4215_s27  ;;  %1166 = vrot.lane.b32.xlu0 %v4526_v34, %s4217_s14 }
  0x90   : > { %1259 = vrot.lane.b32.xlu1 %v4541_v35, %s4217_s14  ;;  %1170 = vrot.lane.b32.xlu0 %v4541_v35, %s4214_s22 }
  0x94   : > { %1346 = vrot.lane.b32.xlu1 %v4526_v34, %s4216_s29  ;;  %1263 = vrot.lane.b32.xlu0 %v4548_v36, %s4214_s22 }
  0x98   : > { %1439 = vrot.lane.b32.xlu1 %v4541_v35, %s4216_s29  ;;  %1349 = vrot.lane.b32.xlu0 %v4541_v35, %s4215_s27 }
  0x9c   : > { %1442 = vrot.lane.b32.xlu1 %v4548_v36, %s4215_s27  ;;  %1352 = vrot.lane.b32.xlu0 %v4548_v36, %s4217_s14 }
  0xa0   : > { %1445 = vrot.lane.b32.xlu1 %v4563_v37, %s4217_s14  ;;  %1356 = vrot.lane.b32.xlu0 %v4563_v37, %s4214_s22 }
  0xa4   : > { %1532 = vrot.lane.b32.xlu1 %v4548_v36, %s4216_s29  ;;  %1449 = vrot.lane.b32.xlu0 %v4570_v38, %s4214_s22 }
  0xa8   : > { %1625 = vrot.lane.b32.xlu1 %v4563_v37, %s4216_s29  ;;  %1535 = vrot.lane.b32.xlu0 %v4563_v37, %s4215_s27 }
  0xac   : > { %1628 = vrot.lane.b32.xlu1 %v4570_v38, %s4215_s27  ;;  %1538 = vrot.lane.b32.xlu0 %v4570_v38, %s4217_s14 }
  0xb0   : > { %1631 = vrot.lane.b32.xlu1 %v4585_v39, %s4217_s14  ;;  %1542 = vrot.lane.b32.xlu0 %v4585_v39, %s4214_s22 }
  0xb4   : > { %1718 = vrot.lane.b32.xlu1 %v4570_v38, %s4216_s29  ;;  %1635 = vrot.lane.b32.xlu0 %v4592_v40, %s4214_s22 }
  0xb8   : > { %1811 = vrot.lane.b32.xlu1 %v4585_v39, %s4216_s29  ;;  %1721 = vrot.lane.b32.xlu0 %v4585_v39, %s4215_s27 }
  0xbc   : > { %1814 = vrot.lane.b32.xlu1 %v4592_v40, %s4215_s27  ;;  %1724 = vrot.lane.b32.xlu0 %v4592_v40, %s4217_s14 }
  0xc0   : > { %1817 = vrot.lane.b32.xlu1 %v3379_v41, %s4217_s14  ;;  %1728 = vrot.lane.b32.xlu0 %v3379_v41, %s4214_s22 }
  0xc2   : > { %v506_v43 = vpop.permute.xlu1 %505  ;;  %v498_v44 = vpop.permute.xlu0 %497 }
  0xc3   : > { %v509_v45 = vsel %vm508_vm4, 0.0, %v498_v44 }
  0xc4   : > { %1821 = vrot.lane.b32.xlu0 %v3380_v42, %s4214_s22  ;;  %1904 = vrot.lane.b32.xlu1 %v4592_v40, %s4216_s29 }
  0xc6   : > { %v602_v46 = vpop.permute.xlu1 %601  ;;  %v502_v47 = vpop.permute.xlu0 %501 }
  0xc7   : > { %v511_v48 = vsel %vm510_vm5, %v509_v45, %v502_v47  ;;  %v615_v49 = vsel %vm614_vm6, 0.0, %v602_v46 }
  0xc8   : > { %1907 = vrot.lane.b32.xlu0 %v3379_v41, %s4215_s27  ;;  %v513_v50 = vsel %vm512_vm7, %v511_v48, %v506_v43  ;;  %1997 = vrot.lane.b32.xlu1 %v3379_v41, %s4216_s29  ;;  %s4221_s29 = smov 32  }
  0xc9   : > { %3533 = vmatmul.mubr.msk.f32.vlgmr.msra.gmra.mrb[0].mxu0 %vm520_vm8, %v513_v50 }
  0xca   : > { %v608_v51 = vpop.permute.xlu1 %607  ;;  %v605_v52 = vpop.permute.xlu0 %604  ;;  %3745 = vmatpush3.bf16.msk.msra.mxu0 %vm4454_vm3, %v4452_v27  ;;  %3539 = vmatprep.mubr.msk.f32.mxu0 %vm4212_vm0, %v4213_v21 }
  0xcb   : > { %v616_v53 = vsel %vm508_vm4, %v615_v49, %v605_v52  ;;  %3746 = vmatprep.subr.bf16.mxu0 %v4211_v20 }
  0xcc   : > { %1910 = vrot.lane.b32.xlu0 %v3380_v42, %s4217_s14  ;;  %2000 = vrot.lane.b32.xlu1 %v3380_v42, %s4215_s27  ;;  %v617_v56 = vsel %vm510_vm5, %v616_v53, %v608_v51  ;;  %s4146_s27 = scalar_lea.vmem %s4145_s18, 512 }
  0xce   : > { %v696_v55 = vpop.permute.xlu1 %695  ;;  %v612_v57 = vpop.permute.xlu0 %611 }
  0xcf   : > { %v618_v58 = vsel %vm512_vm7, %v617_v56, %v612_v57  ;;  %v708_v59 = vsel %vm614_vm6, %v4433_v23, %v696_v55 }
  0xd0   : > { %1914 = vrot.lane.b32.xlu0 %v3381_v54, %s4214_s22  ;;  %3540 = vmatmul.mubr.msk.f32.vlgmr.msra.gmra.mrb[2].mxu0 %vm520_vm8, %v618_v58 }
  0xd1   : > { %2003 = vrot.lane.b32.xlu1 %v3381_v54, %s4217_s14  ;;  %3749 = vmatpush3.bf16.msk.msra.mxu0 %vm4454_vm3, %v4452_v27 }
  0xd2   : > { %v702_v61 = vpop.permute.xlu1 %701  ;;  %v699_v62 = vpop.permute.xlu0 %698  ;;  %3546 = vmatprep.mubr.msk.f32.mxu0 %vm4212_vm0, %v4213_v21  ;;  %3754 = vmatprep.subr.bf16.mxu0 %v4211_v20 }
  0xd3   : > { %v709_v63 = vsel %vm508_vm4, %v708_v59, %v699_v62 }
  0xd4   : > { %2007 = vrot.lane.b32.xlu0 %v3382_v60, %s4214_s22  ;;  %v710_v1 = vsel %vm510_vm5, %v709_v63, %v702_v61 }
  0xd6   : > { %v789_v0 = vpop.permute.xlu1 %788  ;;  %v706_v2 = vpop.permute.xlu0 %705 }
  0xd7   : > { %v711_v3 = vsel %vm512_vm7, %v710_v1, %v706_v2  ;;  %v801_v6 = vsel %vm614_vm6, %v4440_v24, %v789_v0 }
  0xd8   : > { %3547 = vmatmul.mubr.msk.f32.vlgmr.msra.gmra.mrb[4].mxu0 %vm520_vm8, %v711_v3 }
  0xd9   : > { %3757 = vmatpush3.bf16.msk.msra.mxu0 %vm4454_vm3, %v4452_v27  ;;  %3560 = vmatprep.mubr.msk.f32.mxu0 %vm4212_vm0, %v4213_v21 }
  0xda   : > { %v882_v4 = vpop.permute.xlu1 %881  ;;  %v792_v5 = vpop.permute.xlu0 %791  ;;  %3762 = vmatprep.subr.bf16.mxu0 %v4211_v20 }
  0xdb   : > { %v802_v9 = vsel %vm508_vm4, %v801_v6, %v792_v5  ;;  %v894_v10 = vsel %vm614_vm6, %v4430_v22, %v882_v4 }
  0xde   : > { %v885_v7 = vpop.permute.xlu1 %884  ;;  %v795_v8 = vpop.permute.xlu0 %794 }
  0xdf   : > { %v803_v11 = vsel %vm510_vm5, %v802_v9, %v795_v8  ;;  %v895_v15 = vsel %vm508_vm4, %v894_v10, %v885_v7 }
  0xe2   : > { %v888_v12 = vpop.permute.xlu1 %887  ;;  %v799_v13 = vpop.permute.xlu0 %798 }
  0xe3   : > { %v804_v14 = vsel %vm512_vm7, %v803_v11, %v799_v13  ;;  %v896_v16 = vsel %vm510_vm5, %v895_v15, %v888_v12 }
  0xe4   : > { %3554 = vmatmul.mubr.msk.f32.vlgmr.msra.gmra.mrb[0].mxu1 %vm520_vm8, %v804_v14 }
  0xe5   : > { %3761 = vmatpush3.bf16.msk.msra.mxu1 %vm4454_vm3, %v4452_v27  ;;  %3567 = vmatprep.mubr.msk.f32.mxu1 %vm4212_vm0, %v4213_v21 }
  0xe6   : > { %v975_v17 = vpop.permute.xlu1 %974  ;;  %v892_v18 = vpop.permute.xlu0 %891  ;;  %3766 = vmatprep.subr.bf16.mxu1 %v4211_v20 }
  0xe7   : > { %v897_v19 = vsel %vm512_vm7, %v896_v16, %v892_v18  ;;  %v987_v24 = vsel %vm614_vm6, %v4463_v29, %v975_v17 }
  0xe8   : > { %3561 = vmatmul.mubr.msk.f32.vlgmr.msra.gmra.mrb[6].mxu0 %vm520_vm8, %v897_v19 }
  0xe9   : > { %3765 = vmatpush3.bf16.msk.msra.mxu0 %vm4454_vm3, %v4452_v27  ;;  %3574 = vmatprep.mubr.msk.f32.mxu0 %vm4212_vm0, %v4213_v21 }
  0xea   : > { %v1068_v22 = vpop.permute.xlu1 %1067  ;;  %v978_v23 = vpop.permute.xlu0 %977  ;;  %3770 = vmatprep.subr.bf16.mxu0 %v4211_v20 }
  0xeb   : > { %v988_v41 = vsel %vm508_vm4, %v987_v24, %v978_v23  ;;  %v1080_v42 = vsel %vm614_vm6, %v4482_v30, %v1068_v22 }
  0xee   : > { %v1071_v25 = vpop.permute.xlu1 %1070  ;;  %v981_v26 = vpop.permute.xlu0 %980 }
  0xef   : > { %v989_v43 = vsel %vm510_vm5, %v988_v41, %v981_v26  ;;  %v1081_v47 = vsel %vm508_vm4, %v1080_v42, %v1071_v25 }
  0xf2   : > { %v1074_v44 = vpop.permute.xlu1 %1073  ;;  %v985_v45 = vpop.permute.xlu0 %984 }
  0xf3   : > { %v990_v46 = vsel %vm512_vm7, %v989_v43, %v985_v45  ;;  %v1082_v29 = vsel %vm510_vm5, %v1081_v47, %v1074_v44 }
  0xf4   : > { %3568 = vmatmul.mubr.msk.f32.vlgmr.msra.gmra.mrb[2].mxu1 %vm520_vm8, %v990_v46 }
  0xf5   : > { %3769 = vmatpush3.bf16.msk.msra.mxu1 %vm4454_vm3, %v4452_v27  ;;  %3581 = vmatprep.mubr.msk.f32.mxu1 %vm4212_vm0, %v4213_v21 }
  0xf6   : > { %v1161_v30 = vpop.permute.xlu1 %1160  ;;  %v1078_v48 = vpop.permute.xlu0 %1077  ;;  %3774 = vmatprep.subr.bf16.mxu1 %v4211_v20 }
  0xf7   : > { %v1083_v49 = vsel %vm512_vm7, %v1082_v29, %v1078_v48  ;;  %v1173_v52 = vsel %vm614_vm6, %v4497_v31, %v1161_v30 }
  0xf8   : > { %3575 = vmatmul.mubr.msk.f32.vlgmr.msra.gmra.mrb[8].mxu0 %vm520_vm8, %v1083_v49 }
  0xf9   : > { %3773 = vmatpush3.bf16.msk.msra.mxu0 %vm4454_vm3, %v4452_v27  ;;  %3588 = vmatprep.mubr.msk.f32.mxu0 %vm4212_vm0, %v4213_v21 }
  0xfa   : > { %v1254_v50 = vpop.permute.xlu1 %1253  ;;  %v1164_v51 = vpop.permute.xlu0 %1163  ;;  %3778 = vmatprep.subr.bf16.mxu0 %v4211_v20 }
  0xfb   : > { %v1174_v55 = vsel %vm508_vm4, %v1173_v52, %v1164_v51  ;;  %v1266_v56 = vsel %vm614_vm6, %v4504_v32, %v1254_v50 }
  0xfe   : > { %v1257_v53 = vpop.permute.xlu1 %1256  ;;  %v1167_v54 = vpop.permute.xlu0 %1166 }
  0xff   : > { %v1175_v57 = vsel %vm510_vm5, %v1174_v55, %v1167_v54  ;;  %v1267_v61 = vsel %vm508_vm4, %v1266_v56, %v1257_v53 }
 0x102   : > { %v1260_v58 = vpop.permute.xlu1 %1259  ;;  %v1171_v59 = vpop.permute.xlu0 %1170 }
 0x103   : > { %v1176_v60 = vsel %vm512_vm7, %v1175_v57, %v1171_v59  ;;  %v1268_v31 = vsel %vm510_vm5, %v1267_v61, %v1260_v58 }
 0x104   : > { %3582 = vmatmul.mubr.msk.f32.vlgmr.msra.gmra.mrb[4].mxu1 %vm520_vm8, %v1176_v60 }
 0x105   : > { %3777 = vmatpush3.bf16.msk.msra.mxu1 %vm4454_vm3, %v4452_v27  ;;  %3595 = vmatprep.mubr.msk.f32.mxu1 %vm4212_vm0, %v4213_v21 }
 0x106   : > { %v1347_v32 = vpop.permute.xlu1 %1346  ;;  %v1264_v62 = vpop.permute.xlu0 %1263  ;;  %3782 = vmatprep.subr.bf16.mxu1 %v4211_v20 }
 0x107   : > { %v1269_v63 = vsel %vm512_vm7, %v1268_v31, %v1264_v62  ;;  %v1359_v2 = vsel %vm614_vm6, %v4519_v33, %v1347_v32 }
 0x108   : > { %3589 = vmatmul.mubr.msk.f32.vlgmr.msra.gmra.mrb[10].mxu0 %vm520_vm8, %v1269_v63 }
 0x109   : > { %3781 = vmatpush3.bf16.msk.msra.mxu0 %vm4454_vm3, %v4452_v27  ;;  %3602 = vmatprep.mubr.msk.f32.mxu0 %vm4212_vm0, %v4213_v21 }
 0x10a   : > { %v1440_v0 = vpop.permute.xlu1 %1439  ;;  %v1350_v1 = vpop.permute.xlu0 %1349  ;;  %3786 = vmatprep.subr.bf16.mxu0 %v4211_v20 }
 0x10b   : > { %v1360_v5 = vsel %vm508_vm4, %v1359_v2, %v1350_v1  ;;  %v1452_v6 = vsel %vm614_vm6, %v4526_v34, %v1440_v0 }
 0x10e   : > { %v1443_v3 = vpop.permute.xlu1 %1442  ;;  %v1353_v4 = vpop.permute.xlu0 %1352 }
 0x10f   : > { %v1361_v7 = vsel %vm510_vm5, %v1360_v5, %v1353_v4  ;;  %v1453_v11 = vsel %vm508_vm4, %v1452_v6, %v1443_v3 }
 0x112   : > { %v1446_v8 = vpop.permute.xlu1 %1445  ;;  %v1357_v9 = vpop.permute.xlu0 %1356 }
 0x113   : > { %v1362_v10 = vsel %vm512_vm7, %v1361_v7, %v1357_v9  ;;  %v1454_v33 = vsel %vm510_vm5, %v1453_v11, %v1446_v8  ;;  %v4820_v7 = vld [vmem:[%s5496_s2] ss:$0 sm:$0xff] }
 0x114   : > { %3596 = vmatmul.mubr.msk.f32.vlgmr.msra.gmra.mrb[6].mxu1 %vm520_vm8, %v1362_v10 }
 0x115   : > { %3785 = vmatpush3.bf16.msk.msra.mxu1 %vm4454_vm3, %v4452_v27  ;;  %3609 = vmatprep.mubr.msk.f32.mxu1 %vm4212_vm0, %v4213_v21 }
 0x116   : > { %v1533_v34 = vpop.permute.xlu1 %1532  ;;  %v1450_v12 = vpop.permute.xlu0 %1449  ;;  %3790 = vmatprep.subr.bf16.mxu1 %v4211_v20 }
 0x117   : > { %v1455_v13 = vsel %vm512_vm7, %v1454_v33, %v1450_v12  ;;  %v1545_v16 = vsel %vm614_vm6, %v4541_v35, %v1533_v34 }
 0x118   : > { %3603 = vmatmul.mubr.msk.f32.vlgmr.msra.gmra.mrb[12].mxu0 %vm520_vm8, %v1455_v13 }
 0x119   : > { %3789 = vmatpush3.bf16.msk.msra.mxu0 %vm4454_vm3, %v4452_v27  ;;  %3616 = vmatprep.mubr.msk.f32.mxu0 %vm4212_vm0, %v4213_v21 }
 0x11a   : > { %v1626_v14 = vpop.permute.xlu1 %1625  ;;  %v1536_v15 = vpop.permute.xlu0 %1535  ;;  %3794 = vmatprep.subr.bf16.mxu0 %v4211_v20 }
 0x11b   : > { %v1546_v19 = vsel %vm508_vm4, %v1545_v16, %v1536_v15  ;;  %v1638_v22 = vsel %vm614_vm6, %v4548_v36, %v1626_v14 }
 0x11e   : > { %v1629_v17 = vpop.permute.xlu1 %1628  ;;  %v1539_v18 = vpop.permute.xlu0 %1538 }
 0x11f   : > { %v1547_v23 = vsel %vm510_vm5, %v1546_v19, %v1539_v18  ;;  %v1639_v41 = vsel %vm508_vm4, %v1638_v22, %v1629_v17  ;;  %v2090_v19 = vld [vmem:[%s5497_s3] sm:$0xff]  ;;  %v2091_v22 = vld [vmem:[%s5497_s3 + $0x8] sm:$0xff] }
 0x122   : > { %v1632_v24 = vpop.permute.xlu1 %1631  ;;  %v1543_v25 = vpop.permute.xlu0 %1542 }
 0x123   : > { %v1548_v26 = vsel %vm512_vm7, %v1547_v23, %v1543_v25  ;;  %v1640_v35 = vsel %vm510_vm5, %v1639_v41, %v1632_v24  ;;  %v4838_v23 = vpack.c.bf16 %v2091_v22, %v2090_v19 }
 0x124   : > { %3610 = vmatmul.mubr.msk.f32.vlgmr.msra.gmra.mrb[8].mxu1 %vm520_vm8, %v1548_v26 }
 0x125   : > { %3793 = vmatpush3.bf16.msk.msra.mxu1 %vm4454_vm3, %v4452_v27  ;;  %3623 = vmatprep.mubr.msk.f32.mxu1 %vm4212_vm0, %v4213_v21 }
 0x126   : > { %v1719_v36 = vpop.permute.xlu1 %1718  ;;  %v1636_v42 = vpop.permute.xlu0 %1635  ;;  %3798 = vmatprep.subr.bf16.mxu1 %v4211_v20 }
 0x127   : > { %v1641_v43 = vsel %vm512_vm7, %v1640_v35, %v1636_v42  ;;  %v1731_v46 = vsel %vm614_vm6, %v4563_v37, %v1719_v36 }
 0x128   : > { %3617 = vmatmul.mubr.msk.f32.vlgmr.msra.gmra.mrb[14].mxu0 %vm520_vm8, %v1641_v43  ;;  %v2092_v43 = vld [vmem:[%s5497_s3 + $0x10] sm:$0xff] }
 0x129   : > { %3797 = vmatpush3.bf16.msk.msra.mxu0 %vm4454_vm3, %v4452_v27  ;;  %3630 = vmatprep.mubr.msk.f32.mxu0 %vm4212_vm0, %v4213_v21 }
 0x12a   : > { %v1812_v44 = vpop.permute.xlu1 %1811  ;;  %v1722_v45 = vpop.permute.xlu0 %1721  ;;  %3802 = vmatprep.subr.bf16.mxu0 %v4211_v20 }
 0x12b   : > { %v1732_v30 = vsel %vm508_vm4, %v1731_v46, %v1722_v45  ;;  %v1824_v48 = vsel %vm614_vm6, %v4570_v38, %v1812_v44  ;;  %v2093_v44 = vld [vmem:[%s5497_s3 + $0x18] sm:$0xff]  ;;  %v4862_v46 = vld [vmem:[%s5497_s3 + $0x20] sm:$0xff] }
 0x12c   : > { %v4852_v45 = vpack.c.bf16 %v2093_v44, %v2092_v43 }
 0x12e   : > { %v1815_v47 = vpop.permute.xlu1 %1814  ;;  %v1725_v29 = vpop.permute.xlu0 %1724 }
 0x12f   : > { %v1733_v49 = vsel %vm510_vm5, %v1732_v30, %v1725_v29  ;;  %v1825_v53 = vsel %vm508_vm4, %v1824_v48, %v1815_v47 }
 0x132   : > { %v1818_v50 = vpop.permute.xlu1 %1817  ;;  %v1729_v51 = vpop.permute.xlu0 %1728 }
 0x133   : > { %v1734_v52 = vsel %vm512_vm7, %v1733_v49, %v1729_v51  ;;  %v1826_v37 = vsel %vm510_vm5, %v1825_v53, %v1818_v50 }
 0x134   : > { %3624 = vmatmul.mubr.msk.f32.vlgmr.msra.gmra.mrb[10].mxu1 %vm520_vm8, %v1734_v52 }
 0x135   : > { %3801 = vmatpush3.bf16.msk.msra.mxu1 %vm4454_vm3, %v4452_v27  ;;  %3637 = vmatprep.mubr.msk.f32.mxu1 %vm4212_vm0, %v4213_v21 }
 0x136   : > { %v1822_v38 = vpop.permute.xlu0 %1821  ;;  %v1905_v54 = vpop.permute.xlu1 %1904  ;;  %3806 = vmatprep.subr.bf16.mxu1 %v4211_v20 }
 0x137   : > { %v1827_v55 = vsel %vm512_vm7, %v1826_v37, %v1822_v38  ;;  %v1917_v56 = vsel %vm614_vm6, %v4585_v39, %v1905_v54 }
 0x138   : > { %3631 = vmatmul.mubr.msk.f32.vlgmr.msra.gmra.mrb[16].mxu0 %vm520_vm8, %v1827_v55 }
 0x139   : > { %3805 = vmatpush3.bf16.msk.msra.mxu0 %vm4454_vm3, %v4452_v27  ;;  %3644 = vmatprep.mubr.msk.f32.mxu0 %vm4212_vm0, %v4213_v21 }
 0x13a   : > { %v1908_v57 = vpop.permute.xlu0 %1907  ;;  %v1998_v58 = vpop.permute.xlu1 %1997  ;;  %3812 = vmatprep.subr.bf16.mxu0 %v4211_v20 }
 0x13b   : > { %v1918_v59 = vsel %vm508_vm4, %v1917_v56, %v1908_v57  ;;  %v2010_v60 = vsel %vm614_vm6, %v4592_v40, %v1998_v58 }
 0x13e   : > { %v1911_v61 = vpop.permute.xlu0 %1910  ;;  %v2001_v31 = vpop.permute.xlu1 %2000 }
 0x13f   : > { %v1919_v28 = vsel %vm510_vm5, %v1918_v59, %v1911_v61  ;;  %v2011_v27 = vsel %vm508_vm4, %v2010_v60, %v2001_v31 }
 0x142   : > { %v1915_v32 = vpop.permute.xlu0 %1914 }
 0x143   : > { %v1920_v62 = vsel %vm512_vm7, %v1919_v28, %v1915_v32  ;;  %v2004_v63 = vpop.permute.xlu1 %2003 }
 0x144   : > { %3638 = vmatmul.mubr.msk.f32.vlgmr.msra.gmra.mrb[12].mxu1 %vm520_vm8, %v1920_v62  ;;  %v2012_v39 = vsel %vm510_vm5, %v2011_v27, %v2004_v63 }
 0x145   : > { %3657 = vmatprep.mubr.msk.f32.mxu1 %vm4212_vm0, %v4213_v21  ;;  %3808 = vmatpush3.bf16.msra.mxu1 %v4838_v23 }
 0x146   : > { %v2008_v0 = vpop.permute.xlu0 %2007  ;;  %3809 = vmatprep.subr.bf16.mxu1 %v4211_v20 }
 0x147   : > { %v2013_v40 = vsel %vm512_vm7, %v2012_v39, %v2008_v0 }
 0x148   : > { %3645 = vmatmul.mubr.msk.f32.vlgmr.msra.gmra.mrb[18].mxu0 %vm520_vm8, %v2013_v40 }
 0x149   : > { %3670 = vmatprep.mubr.msk.f32.mxu0 %vm4212_vm0, %v4213_v21  ;;  %3814 = vmatpush3.bf16.msra.mxu0 %v4838_v23 }
 0x14a   : > { %3815 = vmatprep.subr.bf16.mxu0 %v4211_v20  ;;  %3811 = vmatpush3.bf16.msra.mxu1 %v4852_v45 }
 0x14b   : > { %3655 = vmatprep.subr.mxu1 %v4213_v21 }
 0x14d   : > { %3817 = vmatpush3.bf16.msra.mxu0 %v4852_v45 }
 0x14e   : > { %3668 = vmatprep.subr.mxu0 %v4213_v21  ;;  %3656 = vmatpush3.msra.mxu1 %v4862_v46 }
 0x14f   : > { %3818 = vmatprep.subr.bf16.mxu1 %v4211_v20 }
 0x151   : > { %3669 = vmatpush3.msra.mxu0 %v4862_v46 }
 0x152   : > { %3824 = vmatprep.subr.bf16.mxu0 %v4211_v20 }
 0x19c   : > { %v4815_v1 = vpop.f32.mrb[0].mxu0 }
 0x19d   : > { %v3534_v2 = vpop.f32.mrb[1].mxu0 }
 0x1a3   : > { %v688_v3 = vpop.f32.mrb[2].mxu0 }
 0x1a4   : > { %v3541_v4 = vpop.f32.mrb[3].mxu0  ;;  %v689_v9 = vadd.f32 %v4820_v7, %v688_v3 }
 0x1a6   : > { %v693_v13 = vmul.f32 0.01, %v689_v9  ;;  %vm692_vm11 = vcmp.ge.f32.partialorder %v689_v9, 0.0 }
 0x1a8   : > { %v694_v18 = vsel %vm692_vm11, %v689_v9, %v693_v13 }
 0x1ab   : > { %v781_v5 = vpop.f32.mrb[4].mxu0 }
 0x1ac   : > { %v3548_v6 = vpop.f32.mrb[5].mxu0  ;;  %v782_v10 = vadd.f32 %v4820_v7, %v781_v5 }
 0x1ae   : > { %v786_v14 = vmul.f32 0.01, %v782_v10  ;;  %vm785_vm10 = vcmp.ge.f32.partialorder %v782_v10, 0.0 }
 0x1b0   : > { %v4827_v17 = vsel %vm785_vm10, %v782_v10, %v786_v14 }
 0x1b7   : > { %v874_v8 = vpop.f32.mrb[0].mxu1 }
 0x1b8   : > { %v875_v11 = vadd.f32 %v4820_v7, %v874_v8  ;;  %v3555_v33 = vpop.f32.mrb[1].mxu1 }
 0x1ba   : > { %v879_v34 = vmul.f32 0.01, %v875_v11  ;;  %vm878_vm9 = vcmp.ge.f32.partialorder %v875_v11, 0.0 }
 0x1bb   : > { %v967_v12 = vpop.f32.mrb[6].mxu0 }
 0x1bc   : > { %v3562_v15 = vpop.f32.mrb[7].mxu0  ;;  %v880_v16 = vsel %vm878_vm9, %v875_v11, %v879_v34  ;;  %v968_v29 = vadd.f32 %v4820_v7, %v967_v12 }
 0x1bd   : > { %2105 = vrot.lane.b32.xlu0 %v880_v16, %s4219_s24  ;;  %2202 = vrot.lane.b32.xlu1 %v880_v16, %s4214_s22 }
 0x1be   : > { %v972_v51 = vmul.f32 0.01, %v968_v29  ;;  %vm971_vm14 = vcmp.ge.f32.partialorder %v968_v29, 0.0 }
 0x1c0   : > { %v4873_v54 = vsel %vm971_vm14, %v968_v29, %v972_v51  ;;  %vm2117_vm14 = vcmask 261120  }
 0x1c1   : > { %2101 = vrot.lane.b32.xlu0 %v4827_v17, %s4220_s26  ;;  %2097 = vrot.lane.b32.xlu1 %v694_v18, %s4214_s22 }
 0x1c7   : > { %v1060_v24 = vpop.f32.mrb[2].mxu1 }
 0x1c8   : > { %v1061_v25 = vadd.f32 %v4820_v7, %v1060_v24  ;;  %v3569_v26 = vpop.f32.mrb[3].mxu1 }
 0x1ca   : > { %v1065_v41 = vmul.f32 0.01, %v1061_v25  ;;  %vm1064_vm12 = vcmp.ge.f32.partialorder %v1061_v25, 0.0 }
 0x1cb   : > { %v1153_v35 = vpop.f32.mrb[8].mxu0 }
 0x1cc   : > { %v3576_v36 = vpop.f32.mrb[9].mxu0  ;;  %v1066_v42 = vsel %vm1064_vm12, %v1061_v25, %v1065_v41  ;;  %v1154_v52 = vadd.f32 %v4820_v7, %v1153_v35  ;;  %vm2113_vm12 = vcmask 130048  }
 0x1cd   : > { %2209 = vrot.lane.b32.xlu1 %v1066_v42, %s4219_s24 }
 0x1ce   : > { %v1158_v38 = vmul.f32 0.01, %v1154_v52  ;;  %vm1157_vm15 = vcmp.ge.f32.partialorder %v1154_v52, 0.0 }
 0x1d0   : > { %v4879_v55 = vsel %vm1157_vm15, %v1154_v52, %v1158_v38  ;;  %vm2125_vm15 = vcmask 326656  }
 0x1d1   : > { %2296 = vrot.lane.b32.xlu1 %v1066_v42, %s4214_s22 }
 0x1d7   : > { %v1246_v47 = vpop.f32.mrb[4].mxu1 }
 0x1d8   : > { %v1247_v30 = vadd.f32 %v4820_v7, %v1246_v47  ;;  %v3583_v48 = vpop.f32.mrb[5].mxu1 }
 0x1da   : > { %v1251_v49 = vmul.f32 0.01, %v1247_v30  ;;  %vm1250_vm13 = vcmp.ge.f32.partialorder %v1247_v30, 0.0 }
 0x1db   : > { %v1339_v50 = vpop.f32.mrb[10].mxu0 }
 0x1dc   : > { %v3590_v53 = vpop.f32.mrb[11].mxu0  ;;  %v1252_v37 = vsel %vm1250_vm13, %v1247_v30, %v1251_v49  ;;  %v1340_v61 = vadd.f32 %v4820_v7, %v1339_v50  ;;  %v595_v30 = vadd.f32 %v4820_v7, %v4815_v1  ;;  %vm2115_vm13 = vcmask 195584  }
 0x1dd   : > { %2303 = vrot.lane.b32.xlu0 %v1252_v37, %s4219_s24  ;;  %2390 = vrot.lane.b32.xlu1 %v1252_v37, %s4214_s22 }
 0x1de   : > { %v1344_v27 = vmul.f32 0.01, %v1340_v61  ;;  %vm1343_vm2 = vcmp.ge.f32.partialorder %v1340_v61, 0.0  ;;  %v599_v50 = vmul.f32 0.01, %v595_v30  ;;  %vm598_vm11 = vcmp.ge.f32.partialorder %v595_v30, 0.0 }
 0x1e0   : > { %v4889_v32 = vsel %vm1343_vm2, %v1340_v61, %v1344_v27  ;;  %v600_v53 = vsel %vm598_vm11, %v595_v30, %v599_v50  ;;  %v2769_v30 = vld [vmem:[#allocation3 + $0x18] sm:$0xff] }
 0x1e1   : > { %2109 = vrot.lane.b32.xlu0 %v4873_v54, %s4221_s29  ;;  %2205 = vrot.lane.b32.xlu1 %v4873_v54, %s4220_s26 }
 0x1e5   : > { %2213 = vrot.lane.b32.xlu0 %v4879_v55, %s4221_s29 }
 0x1e7   : > { %v1432_v56 = vpop.f32.mrb[6].mxu1 }
 0x1e8   : > { %v1433_v57 = vadd.f32 %v4820_v7, %v1432_v56  ;;  %v3597_v58 = vpop.f32.mrb[7].mxu1 }
 0x1e9   : > { %2299 = vrot.lane.b32.xlu0 %v4879_v55, %s4220_s26 }
 0x1ea   : > { %v1437_v59 = vmul.f32 0.01, %v1433_v57  ;;  %vm1436_vm1 = vcmp.ge.f32.partialorder %v1433_v57, 0.0 }
 0x1eb   : > { %v1525_v60 = vpop.f32.mrb[12].mxu0 }
 0x1ec   : > { %v3604_v31 = vpop.f32.mrb[13].mxu0  ;;  %v1438_v28 = vsel %vm1436_vm1, %v1433_v57, %v1437_v59  ;;  %v1526_v2 = vadd.f32 %v4820_v7, %v1525_v60 }
 0x1ed   : > { %2397 = vrot.lane.b32.xlu1 %v1438_v28, %s4219_s24 }
 0x1ee   : > { %v1530_v8 = vmul.f32 0.01, %v1526_v2  ;;  %vm1529_vm5 = vcmp.ge.f32.partialorder %v1526_v2, 0.0 }
 0x1f0   : > { %v4904_v10 = vsel %vm1529_vm5, %v1526_v2, %v1530_v8 }
 0x1f1   : > { %2484 = vrot.lane.b32.xlu1 %v1438_v28, %s4214_s22 }
 0x1f5   : > { %2393 = vrot.lane.b32.xlu1 %v4889_v32, %s4220_s26 }
 0x1f7   : > { %v1618_v62 = vpop.f32.mrb[8].mxu1 }
 0x1f8   : > { %v1619_v63 = vadd.f32 %v4820_v7, %v1618_v62  ;;  %v3611_v39 = vpop.f32.mrb[9].mxu1 }
 0x1fa   : > { %v1623_v0 = vmul.f32 0.01, %v1619_v63  ;;  %vm1622_vm3 = vcmp.ge.f32.partialorder %v1619_v63, 0.0 }
 0x1fb   : > { %v1711_v40 = vpop.f32.mrb[14].mxu0 }
 0x1fc   : > { %v1712_v3 = vadd.f32 %v4820_v7, %v1711_v40  ;;  %v3618_v4 = vpop.f32.mrb[15].mxu0  ;;  %v1624_v5 = vsel %vm1622_vm3, %v1619_v63, %v1623_v0 }
 0x1fd   : > { %2491 = vrot.lane.b32.xlu0 %v1624_v5, %s4219_s24  ;;  %2578 = vrot.lane.b32.xlu1 %v1624_v5, %s4214_s22 }
 0x1fe   : > { %v1716_v6 = vmul.f32 0.01, %v1712_v3  ;;  %vm1715_vm4 = vcmp.ge.f32.partialorder %v1712_v3, 0.0 }
 0x200   : > { %v4898_v9 = vsel %vm1715_vm4, %v1712_v3, %v1716_v6 }
 0x201   : > { %2307 = vrot.lane.b32.xlu0 %v4889_v32, %s4221_s29  ;;  %2581 = vrot.lane.b32.xlu1 %v4898_v9, %s4220_s26 }
 0x205   : > { %2401 = vrot.lane.b32.xlu0 %v4904_v10, %s4221_s29 }
 0x207   : > { %v1804_v11 = vpop.f32.mrb[10].mxu1 }
 0x208   : > { %v1805_v33 = vadd.f32 %v4820_v7, %v1804_v11  ;;  %v3625_v34 = vpop.f32.mrb[11].mxu1 }
 0x209   : > { %2487 = vrot.lane.b32.xlu0 %v4904_v10, %s4220_s26 }
 0x20a   : > { %v1809_v12 = vmul.f32 0.01, %v1805_v33  ;;  %vm1808_vm6 = vcmp.ge.f32.partialorder %v1805_v33, 0.0 }
 0x20b   : > { %v1897_v13 = vpop.f32.mrb[16].mxu0 }
 0x20c   : > { %v1898_v14 = vadd.f32 %v4820_v7, %v1897_v13  ;;  %v3632_v15 = vpop.f32.mrb[17].mxu0  ;;  %v1810_v16 = vsel %vm1808_vm6, %v1805_v33, %v1809_v12  ;;  %vm2800_vm6 = vcmask 523264  }
 0x20d   : > { %2495 = vrot.lane.b32.xlu0 %v4898_v9, %s4221_s29  ;;  %2585 = vrot.lane.b32.xlu1 %v1810_v16, %s4219_s24 }
 0x20e   : > { %v1902_v18 = vmul.f32 0.01, %v1898_v14  ;;  %vm1901_vm8 = vcmp.ge.f32.partialorder %v1898_v14, 0.0 }
 0x210   : > { %v1903_v19 = vsel %vm1901_vm8, %v1898_v14, %v1902_v18  ;;  %vm2802_vm8 = vcmask 785408  }
 0x211   : > { %2672 = vrot.lane.b32.xlu1 %v1810_v16, %s4214_s22  ;;  %2589 = vrot.lane.b32.xlu0 %v1903_v19, %s4221_s29  ;;  %s4223_s22 = smov 96  }
 0x215   : > { %2675 = vrot.lane.b32.xlu0 %v1903_v19, %s4220_s26  ;;  %s4222_s26 = smov 64  }
 0x217   : > { %v1990_v22 = vpop.f32.mrb[12].mxu1 }
 0x218   : > { %v1991_v24 = vadd.f32 %v4820_v7, %v1990_v22  ;;  %v3639_v25 = vpop.f32.mrb[13].mxu1 }
 0x21a   : > { %v1995_v26 = vmul.f32 0.01, %v1991_v24  ;;  %vm1994_vm9 = vcmp.ge.f32.partialorder %v1991_v24, 0.0 }
 0x21b   : > { %v2083_v41 = vpop.f32.mrb[18].mxu0 }
 0x21c   : > { %v2084_v35 = vadd.f32 %v4820_v7, %v2083_v41  ;;  %v1996_v36 = vsel %vm1994_vm9, %v1991_v24, %v1995_v26  ;;  %v3646_v42 = vpop.f32.mrb[19].mxu0 }
 0x21d   : > { %2679 = vrot.lane.b32.xlu1 %v1996_v36, %s4219_s24  ;;  %s3434_s24 = sshll.u32 %s4296_s13, 8  ;;  %s3266_s13 = scalar_lea.sflag [#allocation5], %s4414_s19 }
 0x21e   : > { %v2088_v43 = vmul.f32 0.01, %v2084_v35  ;;  %vm2087_vm10 = vcmp.ge.f32.partialorder %v2084_v35, 0.0  ;;  %s5450_s17 = scalar_lea.hbm %s5503_s9, %s3434_s24 }
 0x220   : > { %v2089_v44 = vsel %vm2087_vm10, %v2084_v35, %v2088_v43 }
 0x221   : > { %2683 = vrot.lane.b32.xlu0 %v2089_v44, %s4221_s29 }
 0x22f   : > { %v2203_v47 = vpop.permute.xlu1 %2202  ;;  %v2106_v48 = vpop.permute.xlu0 %2105 }
 0x230   : > { %v2216_v1 = vsel %vm512_vm7, %v4827_v17, %v2203_v47  ;;  %v2767_v47 = vld [vmem:[#allocation3 + $0x8] sm:$0xff] }
 0x233   : > { %v2098_v29 = vpop.permute.xlu1 %2097  ;;  %v2102_v51 = vpop.permute.xlu0 %2101 }
 0x234   : > { %v2112_v37 = vsel %vm512_vm7, %v600_v53, %v2098_v29 }
 0x235   : > { %v2114_v57 = vsel %vm2113_vm12, %v2112_v37, %v2102_v51  ;;  %v2772_v51 = vld [vmem:[#allocation3 + $0x30] sm:$0xff]  ;;  %v2774_v37 = vld [vmem:[#allocation3 + $0x40] sm:$0xff] }
 0x236   : > { %v2116_v58 = vsel %vm2115_vm13, %v2114_v57, %v2106_v48  ;;  %v2776_v57 = vld [vmem:[#allocation3 + $0x50] sm:$0xff] }
 0x23f   : > { %v2210_v49 = vpop.permute.xlu1 %2209 }
 0x243   : > { %v2297_v52 = vpop.permute.xlu1 %2296 }
 0x244   : > { %v2310_v39 = vsel %vm512_vm7, %v4873_v54, %v2297_v52  ;;  %v2773_v52 = vld [vmem:[#allocation3 + $0x38] sm:$0xff] }
 0x245   : > { %v3858_v53 = vpack.c.bf16 %v2773_v52, %v2772_v51  ;;  %v3039_v52 = vld [vmem:[%s5501_s7 + $0x200] sm:$0xff] }
 0x24f   : > { %v2391_v38 = vpop.permute.xlu1 %2390  ;;  %v2304_v56 = vpop.permute.xlu0 %2303 }
 0x250   : > { %v2404_v3 = vsel %vm512_vm7, %v4879_v55, %v2391_v38  ;;  %v2775_v38 = vld [vmem:[#allocation3 + $0x48] sm:$0xff] }
 0x253   : > { %v2206_v7 = vpop.permute.xlu1 %2205  ;;  %v2110_v59 = vpop.permute.xlu0 %2109 }
 0x254   : > { %v2217_v60 = vsel %vm2113_vm12, %v2216_v1, %v2206_v7  ;;  %v2118_v61 = vsel %vm2117_vm14, %v2116_v58, %v2110_v59  ;;  %v2777_v1 = vld [vmem:[#allocation3 + $0x58] sm:$0xff]  ;;  %v2778_v58 = vld [vmem:[#allocation3 + $0x60] sm:$0xff]  ;;  %v2779_v59 = vld [vmem:[#allocation3 + $0x68] sm:$0xff] }
 0x255   : > { %3658 = vmatmul.mubr.msk.f32.vlgmr.msra.gmra.mrb[14].mxu1 %vm2125_vm15, %v2118_v61  ;;  %v2218_v31 = vsel %vm2115_vm13, %v2217_v60, %v2210_v49  ;;  %v2771_v49 = vld [vmem:[#allocation3 + $0x28] sm:$0xff]  ;;  %v3864_v7 = vpack.c.bf16 %v2777_v1, %v2776_v57  ;;  %v3867_v60 = vpack.c.bf16 %v2779_v59, %v2778_v58  ;;  %v5022_v61 = vld [vmem:[%s5498_s4] ss:$0 sm:$0xff] }
 0x256   : > { %3820 = vmatpush3.bf16.msra.mxu1 %v4838_v23  ;;  %3683 = vmatprep.mubr.msk.f32.mxu1 %vm4212_vm0, %v4213_v21 }
 0x257   : > { %v2214_v28 = vpop.permute.xlu0 %2213  ;;  %3821 = vmatprep.subr.bf16.mxu1 %v4211_v20 }
 0x258   : > { %v2219_v17 = vsel %vm2117_vm14, %v2218_v31, %v2214_v28 }
 0x259   : > { %3671 = vmatmul.mubr.msk.f32.vlgmr.msra.gmra.mrb[20].mxu0 %vm2125_vm15, %v2219_v17 }
 0x25a   : > { %3823 = vmatpush3.bf16.msra.mxu1 %v4852_v45  ;;  %3826 = vmatpush3.bf16.msra.mxu0 %v4838_v23 }
 0x25b   : > { %3681 = vmatprep.subr.mxu1 %v4213_v21  ;;  %3827 = vmatprep.subr.bf16.mxu0 %v4211_v20  ;;  %v2300_v62 = vpop.permute.xlu0 %2299 }
 0x25c   : > { %3696 = vmatprep.mubr.msk.f32.mxu0 %vm4212_vm0, %v4213_v21  ;;  %v2311_v40 = vsel %vm2113_vm12, %v2310_v39, %v2300_v62  ;;  %v2781_v39 = vld [vmem:[#allocation3 + $0x78] sm:$0xff] }
 0x25d   : > { %v2312_v4 = vsel %vm2115_vm13, %v2311_v40, %v2304_v56  ;;  %v3861_v56 = vpack.c.bf16 %v2775_v38, %v2774_v37  ;;  %v2782_v40 = vld [vmem:[#allocation3 + $0x80] sm:$0xff]  ;;  %v3044_v38 = vld [vmem:[%s5501_s7 + $0x228] sm:$0xff] }
 0x25e   : > { %3682 = vmatpush3.msra.mxu1 %v4862_v46  ;;  %3829 = vmatpush3.bf16.msra.mxu0 %v4852_v45 }
 0x25f   : > { %3694 = vmatprep.subr.mxu0 %v4213_v21  ;;  %3830 = vmatprep.subr.bf16.mxu1 %v4211_v20  ;;  %v2398_v27 = vpop.permute.xlu1 %2397 }
 0x262   : > { %3695 = vmatpush3.msra.mxu0 %v4862_v46 }
 0x263   : > { %3836 = vmatprep.subr.bf16.mxu0 %v4211_v20  ;;  %v2485_v63 = vpop.permute.xlu1 %2484 }
 0x264   : > { %v2498_v34 = vsel %vm512_vm7, %v4889_v32, %v2485_v63  ;;  %v2780_v63 = vld [vmem:[#allocation3 + $0x70] sm:$0xff] }
 0x267   : > { %v2394_v2 = vpop.permute.xlu1 %2393 }
 0x268   : > { %v2405_v6 = vsel %vm2113_vm12, %v2404_v3, %v2394_v2  ;;  %v2783_v2 = vld [vmem:[#allocation3 + $0x88] sm:$0xff] }
 0x269   : > { %v2406_v54 = vsel %vm2115_vm13, %v2405_v6, %v2398_v27  ;;  %v3873_v3 = vpack.c.bf16 %v2783_v2, %v2782_v40  ;;  %v2980_v2 = vld [vmem:[%s5501_s7 + $0x28] sm:$0xff] }
 0x26f   : > { %v2492_v0 = vpop.permute.xlu0 %2491  ;;  %v2579_v11 = vpop.permute.xlu1 %2578 }
 0x270   : > { %v2592_v19 = vsel %vm512_vm7, %v4904_v10, %v2579_v11 }
 0x273   : > { %v2308_v5 = vpop.permute.xlu0 %2307  ;;  %v2582_v13 = vpop.permute.xlu1 %2581 }
 0x274   : > { %v2313_v8 = vsel %vm2117_vm14, %v2312_v4, %v2308_v5  ;;  %v2593_v22 = vsel %vm2113_vm12, %v2592_v19, %v2582_v13  ;;  %v2784_v4 = vld [vmem:[#allocation3 + $0x90] sm:$0xff]  ;;  %v2785_v5 = vld [vmem:[#allocation3 + $0x98] sm:$0xff]  ;;  %v2976_v19 = vld [vmem:[%s5501_s7 + $0x8] sm:$0xff] }
 0x275   : > { %3684 = vmatmul.mubr.msk.f32.vlgmr.msra.gmra.mrb[16].mxu1 %vm2125_vm15, %v2313_v8  ;;  %v3876_v6 = vpack.c.bf16 %v2785_v5, %v2784_v4 }
 0x276   : > { %3832 = vmatpush3.bf16.msra.mxu1 %v4838_v23  ;;  %3709 = vmatprep.mubr.msk.f32.mxu1 %vm4212_vm0, %v4213_v21 }
 0x277   : > { %v2402_v33 = vpop.permute.xlu0 %2401  ;;  %3833 = vmatprep.subr.bf16.mxu1 %v4211_v20 }
 0x278   : > { %v2407_v55 = vsel %vm2117_vm14, %v2406_v54, %v2402_v33 }
 0x279   : > { %3697 = vmatmul.mubr.msk.f32.vlgmr.msra.gmra.mrb[22].mxu0 %vm2125_vm15, %v2407_v55 }
 0x27a   : > { %3835 = vmatpush3.bf16.msra.mxu1 %v4852_v45  ;;  %3838 = vmatpush3.bf16.msra.mxu0 %v4838_v23 }
 0x27b   : > { %v2488_v12 = vpop.permute.xlu0 %2487  ;;  %3707 = vmatprep.subr.mxu1 %v4213_v21  ;;  %3839 = vmatprep.subr.bf16.mxu0 %v4211_v20 }
 0x27c   : > { %v2499_v14 = vsel %vm2113_vm12, %v2498_v34, %v2488_v12  ;;  %3722 = vmatprep.mubr.msk.f32.mxu0 %vm4212_vm0, %v4213_v21 }
 0x27d   : > { %v2500_v15 = vsel %vm2115_vm13, %v2499_v14, %v2492_v0  ;;  %v3870_v0 = vpack.c.bf16 %v2781_v39, %v2780_v63  ;;  %v3050_v63 = vld [vmem:[%s5501_s7 + $0x258] sm:$0xff]  ;;  %v2975_v39 = vld [vmem:[%s5501_s7] sm:$0xff] }
 0x27e   : > { %3708 = vmatpush3.msra.mxu1 %v4862_v46  ;;  %3841 = vmatpush3.bf16.msra.mxu0 %v4852_v45 }
 0x27f   : > { %v2496_v16 = vpop.permute.xlu0 %2495  ;;  %3720 = vmatprep.subr.mxu0 %v4213_v21  ;;  %3842 = vmatprep.subr.bf16.mxu1 %v4211_v20  ;;  %v2586_v32 = vpop.permute.xlu1 %2585 }
 0x280   : > { %v2501_v18 = vsel %vm2117_vm14, %v2500_v15, %v2496_v16  ;;  %v2594_v24 = vsel %vm2115_vm13, %v2593_v22, %v2586_v32  ;;  %v2978_v22 = vld [vmem:[%s5501_s7 + $0x18] sm:$0xff] }
 0x281   : > { %3710 = vmatmul.mubr.msk.f32.vlgmr.msra.gmra.mrb[18].mxu1 %vm2125_vm15, %v2501_v18 }
 0x282   : > { %3721 = vmatpush3.msra.mxu0 %v4862_v46  ;;  %3844 = vmatpush3.bf16.msra.mxu1 %v4838_v23 }
 0x283   : > { %v2590_v25 = vpop.permute.xlu0 %2589  ;;  %3845 = vmatprep.subr.bf16.mxu1 %v4211_v20  ;;  %3735 = vmatprep.mubr.msk.f32.mxu1 %vm4212_vm0, %v4213_v21  ;;  %v2673_v23 = vpop.permute.xlu1 %2672 }
 0x284   : > { %v2595_v26 = vsel %vm2117_vm14, %v2594_v24, %v2590_v25  ;;  %3848 = vmatprep.subr.bf16.mxu0 %v4211_v20  ;;  %v2686_v41 = vsel %vm512_vm7, %v4898_v9, %v2673_v23  ;;  %v2770_v9 = vld [vmem:[#allocation3 + $0x20] sm:$0xff]  ;;  %v3908_v24 = vpack.c.bf16 %v2978_v22, %v2976_v19  ;;  %v3040_v25 = vld [vmem:[%s5501_s7 + $0x208] sm:$0xff] }
 0x285   : > { %3723 = vmatmul.mubr.msk.f32.vlgmr.msra.gmra.mrb[24].mxu0 %vm2125_vm15, %v2595_v26  ;;  %v3855_v50 = vpack.c.bf16 %v2771_v49, %v2770_v9  ;;  %v3042_v26 = vld [vmem:[%s5501_s7 + $0x218] sm:$0xff]  ;;  %v3051_v22 = vld [vmem:[%s5501_s7 + $0x260] sm:$0xff] }
 0x286   : > { %3847 = vmatpush3.bf16.msra.mxu1 %v4852_v45  ;;  %v2766_v45 = vld [vmem:[#allocation3] sm:$0xff] }
 0x287   : > { %3733 = vmatprep.subr.mxu1 %v4213_v21  ;;  %v2676_v10 = vpop.permute.xlu0 %2675  ;;  %v3849_v29 = vpack.c.bf16 %v2767_v47, %v2766_v45 }
 0x288   : > { %v2687_v35 = vsel %vm2113_vm12, %v2686_v41, %v2676_v10  ;;  %v3972_v10 = vpack.c.bf16 %v3042_v26, %v3040_v25  ;;  %v3056_v26 = vld [vmem:[%s5501_s7 + $0x288] sm:$0xff] }
 0x289   : > { %3850 = vmatpush1.bf16.msra.mxu0 %v3849_v29 }
 0x28a   : > { %3734 = vmatpush3.msra.mxu1 %v4862_v46  ;;  %v2768_v46 = vld [vmem:[#allocation3 + $0x10] sm:$0xff]  ;;  %3851 = vmatprep.subr.bf16.mxu0 %v4211_v20 }
 0x28b   : > { %3878 = vmatprep.subr.bf16.mxu1 %v4211_v20  ;;  %v3852_v48 = vpack.c.bf16 %v2769_v30, %v2768_v46 }
 0x28d   : > { %3853 = vmatpush1.bf16.msra.mxu0 %v3852_v48 }
 0x28e   : > { %3854 = vmatprep.subr.bf16.mxu0 %v4211_v20 }
 0x28f   : > { %v2680_v36 = vpop.permute.xlu1 %2679 }
 0x290   : > { %v2688_v42 = vsel %vm2115_vm13, %v2687_v35, %v2680_v36 }
 0x291   : > { %3856 = vmatpush1.bf16.msra.mxu0 %v3855_v50 }
 0x292   : > { %3857 = vmatprep.subr.bf16.mxu0 %v4211_v20 }
 0x293   : > { %v2684_v43 = vpop.permute.xlu0 %2683 }
 0x294   : > { %v2689_v44 = vsel %vm2117_vm14, %v2688_v42, %v2684_v43 }
 0x295   : > { %3736 = vmatmul.mubr.msk.f32.vlgmr.msra.gmra.mrb[20].mxu1 %vm2125_vm15, %v2689_v44  ;;  %3859 = vmatpush1.bf16.msra.mxu0 %v3858_v53 }
 0x296   : > { %3880 = vmatpush1.bf16.msra.mxu1 %v3849_v29  ;;  %3860 = vmatprep.subr.bf16.mxu0 %v4211_v20 }
 0x297   : > { %3881 = vmatprep.subr.bf16.mxu1 %v4211_v20 }
 0x299   : > { %3862 = vmatpush1.bf16.msra.mxu0 %v3861_v56 }
 0x29a   : > { %3883 = vmatpush1.bf16.msra.mxu1 %v3852_v48  ;;  %3863 = vmatprep.subr.bf16.mxu0 %v4211_v20 }
 0x29b   : > { %3884 = vmatprep.subr.bf16.mxu1 %v4211_v20 }
 0x29d   : > { %3865 = vmatpush1.bf16.msra.mxu0 %v3864_v7 }
 0x29e   : > { %3886 = vmatpush1.bf16.msra.mxu1 %v3855_v50  ;;  %3866 = vmatprep.subr.bf16.mxu0 %v4211_v20 }
 0x29f   : > { %3887 = vmatprep.subr.bf16.mxu1 %v4211_v20 }
 0x2a1   : > { %3868 = vmatpush1.bf16.msra.mxu0 %v3867_v60 }
 0x2a2   : > { %3889 = vmatpush1.bf16.msra.mxu1 %v3858_v53  ;;  %3869 = vmatprep.subr.bf16.mxu0 %v4211_v20  ;;  %v3041_v53 = vld [vmem:[%s5501_s7 + $0x210] sm:$0xff] }
 0x2a3   : > { %3890 = vmatprep.subr.bf16.mxu1 %v4211_v20  ;;  %v3974_v58 = vpack.c.bf16 %v3041_v53, %v3039_v52 }
 0x2a5   : > { %3871 = vmatpush1.bf16.msra.mxu0 %v3870_v0 }
 0x2a6   : > { %3892 = vmatpush1.bf16.msra.mxu1 %v3861_v56  ;;  %3872 = vmatprep.subr.bf16.mxu0 %v4211_v20  ;;  %v3046_v56 = vld [vmem:[%s5501_s7 + $0x238] sm:$0xff] }
 0x2a7   : > { %3893 = vmatprep.subr.bf16.mxu1 %v4211_v20 }
 0x2a9   : > { %3874 = vmatpush1.bf16.msra.mxu0 %v3873_v3 }
 0x2aa   : > { %3895 = vmatpush1.bf16.msra.mxu1 %v3864_v7  ;;  %3875 = vmatprep.subr.bf16.mxu0 %v4211_v20 }
 0x2ab   : > { %3896 = vmatprep.subr.bf16.mxu1 %v4211_v20 }
 0x2ad   : > { %3877 = vmatpush1.bf16.msra.mxu0 %v3876_v6 }
 0x2ae   : > { %3898 = vmatpush1.bf16.msra.mxu1 %v3867_v60  ;;  %3973 = vmatprep.subr.bf16.mxu0 %v3972_v10 }
 0x2af   : > { %3899 = vmatprep.subr.bf16.mxu1 %v4211_v20 }
 0x2b2   : > { %3901 = vmatpush1.bf16.msra.mxu1 %v3870_v0  ;;  %v2977_v0 = vld [vmem:[%s5501_s7 + $0x10] sm:$0xff] }
 0x2b3   : > { %3902 = vmatprep.subr.bf16.mxu1 %v4211_v20 }
 0x2b6   : > { %3904 = vmatpush1.bf16.msra.mxu1 %v3873_v3  ;;  %v2982_v3 = vld [vmem:[%s5501_s7 + $0x38] sm:$0xff] }
 0x2b7   : > { %3905 = vmatprep.subr.bf16.mxu1 %v4211_v20 }
 0x2ba   : > { %3907 = vmatpush1.bf16.msra.mxu1 %v3876_v6  ;;  %v3047_v6 = vld [vmem:[%s5501_s7 + $0x240] sm:$0xff] }
 0x2bb   : > { %3909 = vmatprep.subr.bf16.mxu1 %v3908_v24  ;;  %v3053_v24 = vld [vmem:[%s5501_s7 + $0x270] sm:$0xff] }
 0x328   : > { %v2195_v31 = vpop.f32.mrb[14].mxu1 }
 0x329   : > { %v5025_v28 = vadd.f32 %v5022_v61, %v2195_v31  ;;  %v3659_v17 = vpop.f32.mrb[15].mxu1  ;;  %v3043_v31 = vld [vmem:[%s5501_s7 + $0x220] sm:$0xff] }
 0x32a   : > { %v3045_v17 = vld [vmem:[%s5501_s7 + $0x230] sm:$0xff] }
 0x32b   : > { %v2200_v50 = vmul.f32 0.01, %v5025_v28  ;;  %vm2199_vm5 = vcmp.ge.f32.partialorder %v5025_v28, 0.0  ;;  %v3978_v4 = vpack.c.bf16 %v3045_v17, %v3043_v31 }
 0x32c   : > { %v2289_v27 = vpop.f32.mrb[20].mxu0 }
 0x32d   : > { %v3672_v62 = vpop.f32.mrb[21].mxu0  ;;  %v2290_v11 = vadd.f32 %v5022_v61, %v2289_v27  ;;  %v2201_v57 = vsel %vm2199_vm5, %v5025_v28, %v2200_v50  ;;  %v2992_v50 = vld [vmem:[%s5501_s7 + $0x88] sm:$0xff] }
 0x32e   : > { %v3048_v62 = vld [vmem:[%s5501_s7 + $0x248] sm:$0xff] }
 0x32f   : > { %v2294_v12 = vmul.f32 0.01, %v2290_v11  ;;  %vm2293_vm7 = vcmp.ge.f32.partialorder %v2290_v11, 0.0  ;;  %v3980_v5 = vpack.c.bf16 %v3050_v63, %v3048_v62  ;;  %v3068_v63 = vld [vmem:[%s5501_s7 + $0x2e8] sm:$0xff] }
 0x331   : > { %v2295_v16 = vsel %vm2293_vm7, %v2290_v11, %v2294_v12 }
 0x348   : > { %v2383_v8 = vpop.f32.mrb[16].mxu1 }
 0x349   : > { %v2384_v54 = vadd.f32 %v5022_v61, %v2383_v8  ;;  %v3685_v33 = vpop.f32.mrb[17].mxu1  ;;  %v3049_v8 = vld [vmem:[%s5501_s7 + $0x250] sm:$0xff] }
 0x34a   : > { %v3052_v33 = vld [vmem:[%s5501_s7 + $0x268] sm:$0xff] }
 0x34b   : > { %v2388_v55 = vmul.f32 0.01, %v2384_v54  ;;  %vm2387_vm0 = vcmp.ge.f32.partialorder %v2384_v54, 0.0 }
 0x34c   : > { %v2477_v34 = vpop.f32.mrb[22].mxu0 }
 0x34d   : > { %v2478_v13 = vadd.f32 %v5022_v61, %v2477_v34  ;;  %v3698_v14 = vpop.f32.mrb[23].mxu0  ;;  %v5034_v15 = vsel %vm2387_vm0, %v2384_v54, %v2388_v55  ;;  %v3910_v54 = vpack.c.bf16 %v2977_v0, %v2975_v39  ;;  %v3054_v55 = vld [vmem:[%s5501_s7 + $0x278] sm:$0xff] }
 0x34e   : > { %2792 = vrot.lane.b32.xlu0 %v5034_v15, %s4222_s26  ;;  %v2979_v14 = vld [vmem:[%s5501_s7 + $0x20] sm:$0xff]  ;;  %v3984_v19 = vpack.c.bf16 %v3054_v55, %v3052_v33  ;;  %v3070_v39 = vld [vmem:[%s5501_s7 + $0x2f8] sm:$0xff]  ;;  %v3072_v33 = vld [vmem:[%s5501_s7 + $0x308] sm:$0xff] }
 0x34f   : > { %vm2481_vm1 = vcmp.ge.f32.partialorder %v2478_v13, 0.0  ;;  %v2482_v20 = vmul.f32 0.01, %v2478_v13  ;;  %v3074_v55 = vld [vmem:[%s5501_s7 + $0x318] sm:$0xff] }
 0x351   : > { %v2483_v32 = vsel %vm2481_vm1, %v2478_v13, %v2482_v20  ;;  %v3912_v13 = vpack.c.bf16 %v2982_v3, %v2980_v2  ;;  %v2997_v2 = vld [vmem:[%s5501_s7 + $0xb0] sm:$0xff]  ;;  %v3000_v3 = vld [vmem:[%s5501_s7 + $0xc8] sm:$0xff] }
 0x352   : > { %v4107_v18 = vpack.i.bf16 %v2483_v32, %v2295_v16  ;;  %v2984_v16 = vld [vmem:[%s5501_s7 + $0x48] sm:$0xff] }
 0x354   : > { %4108 = vrot.lane.b32.xlu1 %v4107_v18, %s4221_s29  ;;  %v2571_v23 = vpop.f32.mrb[18].mxu1  ;;  %v3982_v18 = vpack.c.bf16 %v3049_v8, %v3047_v6  ;;  %v4000_v6 = vpack.c.bf16 %v3070_v39, %v3068_v63  ;;  %v3067_v8 = vld [vmem:[%s5501_s7 + $0x2e0] sm:$0xff]  ;;  %v3017_v39 = vld [vmem:[%s5501_s7 + $0x150] sm:$0xff]  ;;  %s3364_s29 = sshll.u32 %s4414_s19, 4 }
 0x355   : > { %v2572_v41 = vadd.f32 %v5022_v61, %v2571_v23  ;;  %v3711_v35 = vpop.f32.mrb[19].mxu1  ;;  %v3058_v23 = vld [vmem:[%s5501_s7 + $0x298] sm:$0xff]  ;;  %v3015_v63 = vld [vmem:[%s5501_s7 + $0x140] sm:$0xff] }
 0x356   : > { %v2985_v35 = vld [vmem:[%s5501_s7 + $0x50] sm:$0xff] }
 0x357   : > { %vm2575_vm2 = vcmp.ge.f32.partialorder %v2572_v41, 0.0  ;;  %v2576_v36 = vmul.f32 0.01, %v2572_v41 }
 0x358   : > { %2796 = vrot.lane.b32.xlu1 %v2483_v32, %s4223_s22  ;;  %v2665_v42 = vpop.f32.mrb[24].mxu0  ;;  %v2986_v32 = vld [vmem:[%s5501_s7 + $0x58] sm:$0xff] }
 0x359   : > { %v2666_v43 = vadd.f32 %v5022_v61, %v2665_v42  ;;  %v3724_v44 = vpop.f32.mrb[25].mxu0  ;;  %v2577_v45 = vsel %vm2575_vm2, %v2572_v41, %v2576_v36  ;;  %v3916_v10 = vpack.c.bf16 %v2986_v32, %v2984_v16  ;;  %v2983_v41 = vld [vmem:[%s5501_s7 + $0x40] sm:$0xff]  ;;  %v2988_v36 = vld [vmem:[%s5501_s7 + $0x68] sm:$0xff]  ;;  %v2990_v42 = vld [vmem:[%s5501_s7 + $0x78] sm:$0xff]  ;;  %v4004_v16 = vpack.c.bf16 %v3074_v55, %v3072_v33 }
 0x35a   : > { %2889 = vrot.lane.b32.xlu0 %v2577_v45, %s4222_s26  ;;  %3427 = vmatprep.mubr.msk.f32.mxu0 %vm2117_vm14, %v2577_v45  ;;  %v3988_v44 = vpack.c.bf16 %v3058_v23, %v3056_v26  ;;  %v3055_v45 = vld [vmem:[%s5501_s7 + $0x280] sm:$0xff]  ;;  %v3005_v23 = vld [vmem:[%s5501_s7 + $0xf0] sm:$0xff]  ;;  %v3024_v33 = vld [vmem:[%s5501_s7 + $0x188] sm:$0xff]  ;;  %s455_s26 = scalar_lea.vmem [#allocation6], %s3364_s29 }
 0x35b   : > { %vm2669_vm3 = vcmp.ge.f32.partialorder %v2666_v43, 0.0  ;;  %v2670_v47 = vmul.f32 0.01, %v2666_v43  ;;  %v3071_v32 = vld [vmem:[%s5501_s7 + $0x300] sm:$0xff]  ;;  %v3026_v55 = vld [vmem:[%s5501_s7 + $0x198] sm:$0xff]  ;;  %s3280_s14 = sshll.u32 %s455_s26, 4  ;;  %s5452_s14 = int_to_ptr.vmem [resolvable:$true] %s3280_s14 }
 0x35c   : > { %v3003_v26 = vld [vmem:[%s5501_s7 + $0xe0] sm:$0xff]  ;;  %s4140_s23 = scalar_lea.vmem %s5452_s14, 256  ;;  %p4147_p4 = scmp.lt.s32.totalorder %s5452_s14, %s4145_s18 }
 0x35d   : > { %v2671_v46 = vsel %vm2669_vm3, %v2666_v43, %v2670_v47  ;;  %v3986_v43 = vpack.c.bf16 %v3053_v24, %v3051_v22  ;;  %v3057_v47 = vld [vmem:[%s5501_s7 + $0x290] sm:$0xff]  ;;  %v3076_v22 = vld [vmem:[%s5501_s7 + $0x328] sm:$0xff]  ;;  %v3078_v24 = vld [vmem:[%s5501_s7 + $0x338] sm:$0xff]  ;;  %p4141_p11 = scmp.ne.s32.totalorder %s5452_s14, %s4140_s23  ;;  %p4148_p7 = scmp.lt.s32.totalorder %s4146_s27, %s4140_s23 }
 0x35e   : > { %2893 = vrot.lane.b32.xlu1 %v2671_v46, %s4223_s22  ;;  %v3918_v46 = vpack.c.bf16 %v2985_v35, %v2983_v41  ;;  %v3990_v52 = vpack.c.bf16 %v3057_v47, %v3055_v45  ;;  %v3010_v41 = vld [vmem:[%s5501_s7 + $0x118] sm:$0xff]  ;;  %v3080_v45 = vld [vmem:[%s5501_s7 + $0x348] sm:$0xff] }
 0x35f   : > { %v3082_v47 = vld [vmem:[%s5501_s7 + $0x358] sm:$0xff]  ;;  %p4142_p0 = pnand %p4141_p11, %p5519_p12  ;;  %p4149_p8 = por %p4148_p7, %p4147_p4 }
 0x361   : > { %p4143_p3 = pneg %p4142_p0 }
 0x363   : > { %p4150_p9 = pnand %p4149_p8, %p4143_p3 }
 0x368   : > { %v2759_v29 = vpop.f32.mrb[20].mxu1 }
 0x369   : > { %v2760_v30 = vadd.f32 %v5022_v61, %v2759_v29  ;;  %v3737_v48 = vpop.f32.mrb[21].mxu1  ;;  %v3976_v61 = vpack.c.bf16 %v3046_v56, %v3044_v38  ;;  %v3060_v29 = vld [vmem:[%s5501_s7 + $0x2a8] sm:$0xff]  ;;  %v3061_v38 = vld [vmem:[%s5501_s7 + $0x2b0] sm:$0xff] }
 0x36a   : > { %v3920_v48 = vpack.c.bf16 %v2990_v42, %v2988_v36  ;;  %v4008_v36 = vpack.c.bf16 %v3078_v24, %v3076_v22  ;;  %v3075_v42 = vld [vmem:[%s5501_s7 + $0x320] sm:$0xff]  ;;  %v3029_v22 = vld [vmem:[%s5501_s7 + $0x1b0] sm:$0xff] }
 0x36b   : > { %vm2763_vm4 = vcmp.ge.f32.partialorder %v2760_v30, 0.0  ;;  %v2764_v9 = vmul.f32 0.01, %v2760_v30 }
 0x36d   : > { %v2765_v49 = vsel %vm2763_vm4, %v2760_v30, %v2764_v9  ;;  %v3062_v30 = vld [vmem:[%s5501_s7 + $0x2b8] sm:$0xff]  ;;  %v2987_v9 = vld [vmem:[%s5501_s7 + $0x60] sm:$0xff] }
 0x36e   : > { %3428 = vmatprep.mubr.msk.f32.mxu1 %vm2117_vm14, %v2765_v49  ;;  %v2989_v49 = vld [vmem:[%s5501_s7 + $0x70] sm:$0xff]  ;;  %v3992_v53 = vpack.c.bf16 %v3062_v30, %v3060_v29  ;;  %v3007_v29 = vld [vmem:[%s5501_s7 + $0x100] sm:$0xff] }
 0x36f   : > { %v3922_v56 = vpack.c.bf16 %v2989_v49, %v2987_v9  ;;  %v3009_v30 = vld [vmem:[%s5501_s7 + $0x110] sm:$0xff]  ;;  %v3014_v9 = vld [vmem:[%s5501_s7 + $0x138] sm:$0xff] }
 0x3c0   : > { %v2793_v1 = vpop.permute.xlu0 %2792 }
 0x3c6   : > { %v4109_v51 = vpop.permute.xlu1 %4108 }
 0x3c7   : > { %v4110_v37 = vunpack.i.l.bf16 %v4109_v51  ;;  %v4111_v27 = vunpack.i.h.bf16 %v4109_v51  ;;  %v2994_v51 = vld [vmem:[%s5501_s7 + $0x98] sm:$0xff] }
 0x3c9   : > { %v2799_v7 = vsel %vm2117_vm14, %v2201_v57, %v4110_v37  ;;  %v2896_v11 = vsel %vm2117_vm14, %v5034_v15, %v4111_v27  ;;  %v2981_v15 = vld [vmem:[%s5501_s7 + $0x30] sm:$0xff]  ;;  %v3059_v37 = vld [vmem:[%s5501_s7 + $0x2a0] sm:$0xff]  ;;  %v3064_v57 = vld [vmem:[%s5501_s7 + $0x2c8] sm:$0xff] }
 0x3ca   : > { %v2797_v59 = vpop.permute.xlu1 %2796  ;;  %v2801_v60 = vsel %vm2800_vm6, %v2799_v7, %v2793_v1  ;;  %v3914_v25 = vpack.c.bf16 %v2981_v15, %v2979_v14  ;;  %v3066_v1 = vld [vmem:[%s5501_s7 + $0x2d8] sm:$0xff]  ;;  %v3924_v7 = vpack.c.bf16 %v2994_v51, %v2992_v50  ;;  %v3994_v31 = vpack.c.bf16 %v3061_v38, %v3059_v37  ;;  %v3063_v27 = vld [vmem:[%s5501_s7 + $0x2c0] sm:$0xff]  ;;  %v3004_v14 = vld [vmem:[%s5501_s7 + $0xe8] sm:$0xff] }
 0x3cb   : > { %v2803_v28 = vsel %vm2802_vm8, %v2801_v60, %v2797_v59  ;;  %v2993_v59 = vld [vmem:[%s5501_s7 + $0x90] sm:$0xff]  ;;  %v2996_v60 = vld [vmem:[%s5501_s7 + $0xa8] sm:$0xff]  ;;  %v3996_v17 = vpack.c.bf16 %v3066_v1, %v3064_v57  ;;  %v3006_v15 = vld [vmem:[%s5501_s7 + $0xf8] sm:$0xff]  ;;  %v4012_v50 = vpack.c.bf16 %v3082_v47, %v3080_v45 }
 0x3cc   : > { %2878 = vmatmul.mubr.f32.vlgmr.msra.gmra.mrb[26].mxu0 %v2803_v28  ;;  %v2890_v40 = vpop.permute.xlu0 %2889  ;;  %v3065_v28 = vld [vmem:[%s5501_s7 + $0x2d0] sm:$0xff]  ;;  %v3079_v51 = vld [vmem:[%s5501_s7 + $0x340] sm:$0xff]  ;;  %v3084_v37 = vld [vmem:[%s5501_s7 + $0x368] sm:$0xff] }
 0x3cd   : > { %3975 = vmatpush1.bf16.msra.mxu0 %v3974_v58  ;;  %3250 = vmatprep.mubr.f32.mxu0 %v4213_v21  ;;  %v2897_v34 = vsel %vm2800_vm6, %v2896_v11, %v2890_v40  ;;  %v2991_v58 = vld [vmem:[%s5501_s7 + $0x80] sm:$0xff]  ;;  %v3069_v11 = vld [vmem:[%s5501_s7 + $0x2f0] sm:$0xff]  ;;  %v3086_v38 = vld [vmem:[%s5501_s7 + $0x378] sm:$0xff] }
 0x3ce   : > { %3977 = vmatprep.subr.bf16.mxu0 %v3976_v61  ;;  %v2998_v61 = vld [vmem:[%s5501_s7 + $0xb8] sm:$0xff]  ;;  %v3926_v62 = vpack.c.bf16 %v2993_v59, %v2991_v58  ;;  %v2995_v40 = vld [vmem:[%s5501_s7 + $0xa0] sm:$0xff]  ;;  %v3013_v1 = vld [vmem:[%s5501_s7 + $0x130] sm:$0xff] }
 0x3cf   : > { %v3928_v0 = vpack.c.bf16 %v2998_v61, %v2996_v60  ;;  %v3011_v57 = vld [vmem:[%s5501_s7 + $0x120] sm:$0xff]  ;;  %v3018_v58 = vld [vmem:[%s5501_s7 + $0x158] sm:$0xff]  ;;  %v4016_v60 = vpack.c.bf16 %v3086_v38, %v3084_v37 }
 0x3d0   : > { %v2894_v12 = vpop.permute.xlu1 %2893  ;;  %v3083_v61 = vld [vmem:[%s5501_s7 + $0x360] sm:$0xff] }
 0x3d1   : > { %v2898_v20 = vsel %vm2802_vm8, %v2897_v34, %v2894_v12  ;;  %3979 = vmatpush1.bf16.msra.mxu0 %v3978_v4  ;;  %v3002_v4 = vld [vmem:[%s5501_s7 + $0xd8] sm:$0xff]  ;;  %v2999_v12 = vld [vmem:[%s5501_s7 + $0xc0] sm:$0xff] }
 0x3d2   : > { %2967 = vmatmul.mubr.f32.vlgmr.msra.gmra.mrb[22].mxu1 %v2898_v20  ;;  %3981 = vmatprep.subr.bf16.mxu0 %v3980_v5  ;;  %v3998_v5 = vpack.c.bf16 %v3065_v28, %v3063_v27  ;;  %v3932_v34 = vpack.c.bf16 %v3002_v4, %v3000_v3  ;;  %v4002_v20 = vpack.c.bf16 %v3069_v11, %v3067_v8  ;;  %v3088_v27 = vld [vmem:[%s5501_s7 + $0x388] sm:$0xff]  ;;  %v3090_v28 = vld [vmem:[%s5501_s7 + $0x398] sm:$0xff]  ;;  %v3087_v4 = vld [vmem:[%s5501_s7 + $0x380] sm:$0xff] }
 0x3d3   : > { %3911 = vmatpush1.bf16.msra.mxu1 %v3910_v54  ;;  %v3930_v54 = vpack.c.bf16 %v2997_v2, %v2995_v40  ;;  %v3022_v40 = vld [vmem:[%s5501_s7 + $0x178] sm:$0xff]  ;;  %v4020_v3 = vpack.c.bf16 %v3090_v28, %v3088_v27  ;;  %v3019_v11 = vld [vmem:[%s5501_s7 + $0x160] sm:$0xff] }
 0x3d4   : > { %3913 = vmatprep.subr.bf16.mxu1 %v3912_v13  ;;  %v3001_v13 = vld [vmem:[%s5501_s7 + $0xd0] sm:$0xff] }
 0x3d5   : > { %3983 = vmatpush1.bf16.msra.mxu0 %v3982_v18  ;;  %v3073_v18 = vld [vmem:[%s5501_s7 + $0x310] sm:$0xff] }
 0x3d6   : > { %3985 = vmatprep.subr.bf16.mxu0 %v3984_v19  ;;  %v3934_v19 = vpack.c.bf16 %v3001_v13, %v2999_v12  ;;  %v4006_v35 = vpack.c.bf16 %v3073_v18, %v3071_v32  ;;  %v3956_v13 = vpack.c.bf16 %v3026_v55, %v3024_v33 }
 0x3d7   : > { %3915 = vmatpush1.bf16.msra.mxu1 %v3914_v25  ;;  %v3936_v25 = vpack.c.bf16 %v3006_v15, %v3004_v14  ;;  %v3023_v14 = vld [vmem:[%s5501_s7 + $0x180] sm:$0xff]  ;;  %v3025_v15 = vld [vmem:[%s5501_s7 + $0x190] sm:$0xff] }
 0x3d8   : > { %3917 = vmatprep.subr.bf16.mxu1 %v3916_v10  ;;  %v3008_v10 = vld [vmem:[%s5501_s7 + $0x108] sm:$0xff]  ;;  %v3958_v32 = vpack.c.bf16 %v3025_v15, %v3023_v14 }
 0x3d9   : > { %3987 = vmatpush1.bf16.msra.mxu0 %v3986_v43  ;;  %v3077_v43 = vld [vmem:[%s5501_s7 + $0x330] sm:$0xff] }
 0x3da   : > { %3989 = vmatprep.subr.bf16.mxu0 %v3988_v44  ;;  %v3938_v44 = vpack.c.bf16 %v3005_v23, %v3003_v26  ;;  %v4010_v49 = vpack.c.bf16 %v3077_v43, %v3075_v42  ;;  %v3094_v26 = vld [vmem:[%s5501_s7 + $0x3b8] sm:$0xff]  ;;  %v3093_v42 = vld [vmem:[%s5501_s7 + $0x3b0] sm:$0xff]  ;;  %v3031_v43 = vld [vmem:[%s5501_s7 + $0x1c0] sm:$0xff] }
 0x3db   : > { %3919 = vmatpush1.bf16.msra.mxu1 %v3918_v46  ;;  %v3940_v46 = vpack.c.bf16 %v3010_v41, %v3008_v10  ;;  %v3032_v10 = vld [vmem:[%s5501_s7 + $0x1c8] sm:$0xff]  ;;  %v3034_v41 = vld [vmem:[%s5501_s7 + $0x1d8] sm:$0xff] }
 0x3dc   : > { %3921 = vmatprep.subr.bf16.mxu1 %v3920_v48  ;;  %v3012_v48 = vld [vmem:[%s5501_s7 + $0x128] sm:$0xff] }
 0x3dd   : > { %3991 = vmatpush1.bf16.msra.mxu0 %v3990_v52  ;;  %v3081_v52 = vld [vmem:[%s5501_s7 + $0x350] sm:$0xff] }
 0x3de   : > { %3993 = vmatprep.subr.bf16.mxu0 %v3992_v53  ;;  %v3942_v53 = vpack.c.bf16 %v3009_v30, %v3007_v29  ;;  %v4014_v59 = vpack.c.bf16 %v3081_v52, %v3079_v51  ;;  %v3098_v29 = vld [vmem:[%s5501_s7 + $0x3d8] sm:$0xff]  ;;  %v3097_v51 = vld [vmem:[%s5501_s7 + $0x3d0] sm:$0xff]  ;;  %v3035_v52 = vld [vmem:[%s5501_s7 + $0x1e0] sm:$0xff] }
 0x3df   : > { %3923 = vmatpush1.bf16.msra.mxu1 %v3922_v56  ;;  %v3944_v56 = vpack.c.bf16 %v3014_v9, %v3012_v48  ;;  %v3036_v48 = vld [vmem:[%s5501_s7 + $0x1e8] sm:$0xff]  ;;  %v3038_v9 = vld [vmem:[%s5501_s7 + $0x1f8] sm:$0xff] }
 0x3e0   : > { %3925 = vmatprep.subr.bf16.mxu1 %v3924_v7  ;;  %v3016_v7 = vld [vmem:[%s5501_s7 + $0x148] sm:$0xff] }
 0x3e1   : > { %3995 = vmatpush1.bf16.msra.mxu0 %v3994_v31  ;;  %v3085_v31 = vld [vmem:[%s5501_s7 + $0x370] sm:$0xff] }
 0x3e2   : > { %3997 = vmatprep.subr.bf16.mxu0 %v3996_v17  ;;  %v3946_v17 = vpack.c.bf16 %v3013_v1, %v3011_v57  ;;  %v4018_v2 = vpack.c.bf16 %v3085_v31, %v3083_v61  ;;  %v3102_v57 = vld [vmem:[%s5501_s7 + $0x3f8] sm:$0xff] }
 0x3e3   : > { %3927 = vmatpush1.bf16.msra.mxu1 %v3926_v62  ;;  %v3948_v62 = vpack.c.bf16 %v3018_v58, %v3016_v7  ;;  %v3099_v7 = vld [vmem:[%s5501_s7 + $0x3e0] sm:$0xff]  ;;  %v3101_v58 = vld [vmem:[%s5501_s7 + $0x3f0] sm:$0xff] }
 0x3e4   : > { %3929 = vmatprep.subr.bf16.mxu1 %v3928_v0  ;;  %v3020_v0 = vld [vmem:[%s5501_s7 + $0x168] sm:$0xff] }
 0x3e5   : > { %3999 = vmatpush1.bf16.msra.mxu0 %v3998_v5  ;;  %v3089_v5 = vld [vmem:[%s5501_s7 + $0x390] sm:$0xff]  ;;  %v3952_v8 = vpack.c.bf16 %v3022_v40, %v3020_v0 }
 0x3e6   : > { %4001 = vmatprep.subr.bf16.mxu0 %v4000_v6  ;;  %v3950_v6 = vpack.c.bf16 %v3017_v39, %v3015_v63 }
 0x3e7   : > { %3931 = vmatpush1.bf16.msra.mxu1 %v3930_v54  ;;  %v3021_v54 = vld [vmem:[%s5501_s7 + $0x170] sm:$0xff] }
 0x3e8   : > { %3933 = vmatprep.subr.bf16.mxu1 %v3932_v34  ;;  %v4022_v34 = vpack.c.bf16 %v3089_v5, %v3087_v4  ;;  %v3954_v12 = vpack.c.bf16 %v3021_v54, %v3019_v11  ;;  %v3103_v5 = vld [vmem:[%s5502_s8] sm:$0x3] }
 0x3e9   : > { %4003 = vmatpush1.bf16.msra.mxu0 %v4002_v20  ;;  %v3028_v20 = vld [vmem:[%s5501_s7 + $0x1a8] sm:$0xff] }
 0x3ea   : > { %4005 = vmatprep.subr.bf16.mxu0 %v4004_v16  ;;  %v3030_v16 = vld [vmem:[%s5501_s7 + $0x1b8] sm:$0xff] }
 0x3eb   : > { %3935 = vmatpush1.bf16.msra.mxu1 %v3934_v19  ;;  %v3960_v18 = vpack.c.bf16 %v3030_v16, %v3028_v20  ;;  %v3027_v19 = vld [vmem:[%s5501_s7 + $0x1a0] sm:$0xff] }
 0x3ec   : > { %3937 = vmatprep.subr.bf16.mxu1 %v3936_v25  ;;  %v3962_v24 = vpack.c.bf16 %v3029_v22, %v3027_v19  ;;  %v3092_v25 = vld [vmem:[%s5501_s7 + $0x3a8] sm:$0xff] }
 0x3ed   : > { %4007 = vmatpush1.bf16.msra.mxu0 %v4006_v35  ;;  %v4024_v23 = vpack.c.bf16 %v3094_v26, %v3092_v25  ;;  %v3091_v35 = vld [vmem:[%s5501_s7 + $0x3a0] sm:$0xff] }
 0x3ee   : > { %4009 = vmatprep.subr.bf16.mxu0 %v4008_v36  ;;  %v3964_v36 = vpack.c.bf16 %v3034_v41, %v3032_v10  ;;  %v4026_v45 = vpack.c.bf16 %v3093_v42, %v3091_v35 }
 0x3ef   : > { %3939 = vmatpush1.bf16.msra.mxu1 %v3938_v44  ;;  %v3033_v44 = vld [vmem:[%s5501_s7 + $0x1d0] sm:$0xff] }
 0x3f0   : > { %3941 = vmatprep.subr.bf16.mxu1 %v3940_v46  ;;  %v3966_v47 = vpack.c.bf16 %v3033_v44, %v3031_v43  ;;  %v3096_v46 = vld [vmem:[%s5501_s7 + $0x3c8] sm:$0xff] }
 0x3f1   : > { %4011 = vmatpush1.bf16.msra.mxu0 %v4010_v49  ;;  %v4028_v30 = vpack.c.bf16 %v3098_v29, %v3096_v46  ;;  %v3095_v49 = vld [vmem:[%s5501_s7 + $0x3c0] sm:$0xff] }
 0x3f2   : > { %4013 = vmatprep.subr.bf16.mxu0 %v4012_v50  ;;  %v3968_v50 = vpack.c.bf16 %v3038_v9, %v3036_v48  ;;  %v4030_v37 = vpack.c.bf16 %v3097_v51, %v3095_v49 }
 0x3f3   : > { %3943 = vmatpush1.bf16.msra.mxu1 %v3942_v53  ;;  %v3037_v53 = vld [vmem:[%s5501_s7 + $0x1f0] sm:$0xff] }
 0x3f4   : > { %3945 = vmatprep.subr.bf16.mxu1 %v3944_v56  ;;  %v3970_v38 = vpack.c.bf16 %v3037_v53, %v3035_v52  ;;  %v3100_v56 = vld [vmem:[%s5501_s7 + $0x3e8] sm:$0xff] }
 0x3f5   : > { %4015 = vmatpush1.bf16.msra.mxu0 %v4014_v59  ;;  %v4032_v1 = vpack.c.bf16 %v3102_v57, %v3100_v56  ;;  %v4034_v59 = vpack.c.bf16 %v3101_v58, %v3099_v7 }
 0x3f6   : > { %4017 = vmatprep.subr.bf16.mxu0 %v4016_v60  ;;  %v3426_v60 = vld [vmem:[%s5500_s6] ss:$0 sm:$0xff] }
 0x3f7   : > { %3947 = vmatpush1.bf16.msra.mxu1 %v3946_v17 }
 0x3f8   : > { %3949 = vmatprep.subr.bf16.mxu1 %v3948_v62 }
 0x3f9   : > { %4019 = vmatpush1.bf16.msra.mxu0 %v4018_v2  ;;  %v3105_v2 = vlaneseq }
 0x3fa   : > { %4021 = vmatprep.subr.bf16.mxu0 %v4020_v3 }
 0x3fb   : > { %3951 = vmatpush1.bf16.msra.mxu1 %v3950_v6  ;;  %v3106_v3 = vshrl.u32 %v3105_v2, 7 }
 0x3fc   : > { %3953 = vmatprep.subr.bf16.mxu1 %v3952_v8 }
 0x3fd   : > { %4023 = vmatpush1.bf16.msra.mxu0 %v4022_v34  ;;  %v3107_v4 = vsub.s32 0, %v3106_v3  ;;  %v3111_v6 = vsub.s32 1, %v3106_v3 }
 0x3fe   : > { %4025 = vmatprep.subr.bf16.mxu0 %v4024_v23 }
 0x3ff   : > { %3955 = vmatpush1.bf16.msra.mxu1 %v3954_v12  ;;  %v3108_v8 = vrot.slane %v3103_v5, %v3107_v4  ;;  %v3112_v11 = vrot.slane %v3103_v5, %v3111_v6 }
 0x400   : > { %3957 = vmatprep.subr.bf16.mxu1 %v3956_v13 }
 0x401   : > { %4027 = vmatpush1.bf16.msra.mxu0 %v4026_v45 }
 0x402   : > { %4029 = vmatprep.subr.bf16.mxu0 %v4028_v30 }
 0x403   : > { %3959 = vmatpush1.bf16.msra.mxu1 %v3958_v32 }
 0x404   : > { %3961 = vmatprep.subr.bf16.mxu1 %v3960_v18 }
 0x405   : > { %4031 = vmatpush1.bf16.msra.mxu0 %v4030_v37 }
 0x406   : > { %4033 = vmatprep.subr.bf16.mxu0 %v4032_v1 }
 0x407   : > { %3963 = vmatpush1.bf16.msra.mxu1 %v3962_v24 }
 0x408   : > { %3965 = vmatprep.subr.bf16.mxu1 %v3964_v36 }
 0x409   : > { %4035 = vmatpush1.bf16.msra.mxu0 %v4034_v59 }
 0x40b   : > { %3967 = vmatpush1.bf16.msra.mxu1 %v3966_v47 }
 0x40c   : > { %3969 = vmatprep.subr.bf16.mxu1 %v3968_v50 }
 0x40f   : > { %3971 = vmatpush1.bf16.msra.mxu1 %v3970_v38 }
 0x49f   : > { %v2879_v61 = vpop.f32.mrb[26].mxu0 }
 0x4a0   : > { %v2880_v31 = vadd.f32 %v3426_v60, %v2879_v61  ;;  %v2881_v17 = vpop.f32.mrb[27].mxu0 }
 0x4a2   : > { %v2884_v27 = vmul.f32 0.01, %v2880_v31  ;;  %vm2883_vm9 = vcmp.ge.f32.partialorder %v2880_v31, 0.0 }
 0x4a4   : > { %v2885_v28 = vsel %vm2883_vm9, %v2880_v31, %v2884_v27 }
 0x4a5   : > { %v2968_v62 = vpop.f32.mrb[22].mxu1  ;;  %3179 = vmatprep.mubr.f32.mxu1 %v2885_v28 }
 0x4a6   : > { %v2969_v63 = vadd.f32 %v3426_v60, %v2968_v62  ;;  %v2970_v39 = vpop.f32.mrb[23].mxu1  ;;  %3180 = vmatmul.mubr.f32.vlgmr.msra.gmra.mrb[24].mxu1 %v4213_v21 }
 0x4a8   : > { %vm2972_vm10 = vcmp.ge.f32.partialorder %v2969_v63, 0.0  ;;  %v2973_v0 = vmul.f32 0.01, %v2969_v63 }
 0x4aa   : > { %v2974_v40 = vsel %vm2972_vm10, %v2969_v63, %v2973_v0 }
 0x4ab   : > { %3251 = vmatmul.mubr.f32.vlgmr.msra.gmra.mrb[28].mxu0 %v2974_v40 }
 0x579   : > { %v3181_v54 = vpop.f32.mrb[24].mxu1 }
 0x57a   : > { %v3183_v33 = vpop.f32.mrb[25].mxu1  ;;  %v3182_v55 = vadd.f32 %v3181_v54, %v3108_v8 }
 0x57b   : > { %v3184_v21 = vadd.f32 %v3183_v33, %v3112_v11 }
 0x57e   : > { %v3252_v34 = vpop.f32.mrb[28].mxu0 }
 0x57f   : > { %v3253_v12 = vadd.f32 %v3252_v34, %v3182_v55  ;;  %v3254_v13 = vpop.f32.mrb[29].mxu0 }
 0x580   : > { %v3255_v14 = vadd.f32 %v3254_v13, %v3184_v21 }
 0x581   : > { %vm3257_vm11 = vcmp.ge.f32.partialorder %v3253_v12, 0.0  ;;  %v3259_v15 = vmul.f32 0.01, %v3253_v12 }
 0x582   : > { %vm3258_vm12 = vcmp.ge.f32.partialorder %v3255_v14, 0.0  ;;  %v3260_v20 = vmul.f32 0.01, %v3255_v14 }
 0x583   : > { %v3261_v16 = vsel %vm3257_vm11, %v3253_v12, %v3259_v15 }
 0x584   : > { %3263 = vst [vmem:[%s455_s26] sm:$0xff] %v3261_v16  ;;  %v3262_v32 = vsel %vm3258_vm12, %v3255_v14, %v3260_v20 }
 0x585   : > { %3264 = vst [vmem:[%s455_s26 + $0x8] sm:$0xff] %v3262_v32 }
 0x586   : > { %4153 = shalt.err (!%p4150_p9)
}
 0x587   : > { %s4154_s19 = scalar_lea.hbm %s5450_s17, 256  ;;  %s4158_s24 = scalar_lea.hbm %s5503_s9, 512 }
 0x588   : > { %p4155_p13 = scmp.ne.s32.totalorder %s5450_s17, %s4154_s19  ;;  %p4159_p6 = scmp.lt.u32.totalorder %s5450_s17, %s5503_s9 }
 0x589   : > { %p4160_p10 = scmp.lt.u32.totalorder %s4158_s24, %s4154_s19  ;;  %p4162_p0 = scmp.lt.u32.totalorder %s4154_s19, %s5450_s17 }
 0x58a   : > { %p4156_p2 = pnand %p4155_p13, %p5519_p12 }
 0x58b   : > { %p4161_p11 = por %p4160_p10, %p4159_p6 }
 0x58c   : > { %p4157_p5 = pneg %p4156_p2 }
 0x58d   : > { %p4163_p3 = por %p4162_p0, %p4161_p11 }
 0x58f   : > { %p4164_p4 = pnand %p4163_p3, %p4157_p5 }
 0x591   : > { %4167 = shalt.err (!%p4164_p4)
}
 0x592   : > { %4046 = dma.vmem_to_hbm [thread:$0]  (%p5519_p12), %s5452_s14, 256, %s5450_s17, %s3266_s13  }
 0x593 PF: > { %s3292_s16 = sand.u32 1, %s4194_s30   ;;  %p5520_p7 = scmp.ne.s32.totalorder %s5510_s21, 0 }
 0x594   : > { %s3293_s23 = scalar_lea.sflag [#allocation5], %s3292_s16 }
 0x595   : > { %p4053_p8 = pnand %p3360_p1, %p5520_p7 }
 0x597   : > { %4189 = dma.done.wait (!%p4053_p8), %s3293_s23, 256  }
 0x598   : > { %4191 = vsyncadd (!%p4053_p8), %s3293_s23, 4294967040  ;;  %s5521_s25 = sld [smem:[#allocation9_spill]]  ;;  %p20_p9 = scmp.ge.s32.totalorder %s4300_s15, 4  }
 0x599   : > { %s5522_s30 = smov %s4198_s10  ;;  %s5523_s10 = smov %s4202_s11 }
 0x59a   : > { %s5525_s12 = smov %s4300_s15  ;;  %22 = sbr.rel (!%p20_p9) target bundleno = 4 (0x4), region = 157 }
 0x59e   : > { %s5524_s11 = smov %s5521_s25 }
 0x5a1   :  { %3298 = vsyncpa [#allocation4], 1 }
 0x5a2   :  { %3300 = vsyncpa [#allocation4 + $0x1], 1 }
 0x5a3   :  { %3301 = vsyncpa [#allocation5], 1 }
 0x5a4   :  { %3303 = vsyncpa [#allocation5 + $0x1], 1 }

</bundles_post_ra>
